<compile_context>
chip_gen: v6e
topology: v6e:2x2x1
jax: 0.10.0
libtpu: 0.0.40
codegen_flags: <defaults>
</compile_context>

<pallas_src>
import jax
import jax.numpy as jnp
from jax.experimental import pallas as pl
from jax.experimental.pallas import tpu as pltpu


# ------------------------------ math helpers ------------------------------ #
# Exact (erf-form) GELU, matching torch.nn.functional.gelu's default.  erf is
# built from VPU/EUP-friendly ops (abs / mul / add / recip / exp / select)
# using Abramowitz & Stegun 7.1.26 (|error| <= 1.5e-7), so it lowers cleanly
# in Mosaic.  The reciprocal is injected so the in-kernel version can use the
# EUP approx reciprocal while the references use an exact divide.

_ERF_P = 0.3275911
_ERF_A1 = 0.254829592
_ERF_A2 = -0.284496736
_ERF_A3 = 1.421413741
_ERF_A4 = -1.453152027
_ERF_A5 = 1.061405429
_INV_SQRT2 = 0.7071067811865476


def _gelu_exact(x, reciprocal):
    z = x * _INV_SQRT2
    sign = jnp.where(z >= 0.0, 1.0, -1.0).astype(z.dtype)
    az = jnp.abs(z)
    t = reciprocal(1.0 + _ERF_P * az)
    poly = ((((_ERF_A5 * t + _ERF_A4) * t + _ERF_A3) * t + _ERF_A2) * t + _ERF_A1) * t
    erf = sign * (1.0 - poly * jnp.exp(-az * az))
    return 0.5 * x * (1.0 + erf)


# --------------------------------- kernel ---------------------------------- #

def _feedforward_kernel(x_ref, w1_ref, b1_ref, w2_ref, b2_ref, o_ref):
    # Packed layout (pack rows folded into lanes):
    #   x_ref : (TRp, pack*dim)
    #   w1_ref: (pack*dim, 2*pack*hidden)   block-diagonal, MXU dtype (bf16)
    #   b1_ref: (1, 2*pack*hidden) f32
    #   w2_ref: (pack*hidden, pack*dim)     block-diagonal, MXU dtype (bf16)
    #   b2_ref: (1, pack*dim) f32
    #   o_ref : (TRp, pack*dim)
    half = w2_ref.shape[0]          # pack * hidden
    mxu_dtype = w1_ref.dtype

    # GEMM 1 on the MXU, f32 accumulation.
    h = jnp.dot(x_ref[...].astype(mxu_dtype), w1_ref[...],
                preferred_element_type=jnp.float32)
    h = h + b1_ref[...]

    # GEGLU: first half lanes = values, second half = gates (PyTorch chunk
    # order preserved by the wrapper-side weight packing).  Lane-aligned slices.
    val = h[:, :half]
    gates = h[:, half:]
    y = val * _gelu_exact(gates, lambda v: pl.reciprocal(v, approx=True))

    # Dropout(p=0.0) is the identity.

    # GEMM 2 on the MXU, f32 accumulation; lane-dense (pack*dim) output.
    out = jnp.dot(y.astype(mxu_dtype), w2_ref[...],
                  preferred_element_type=jnp.float32)
    o_ref[...] = (out + b2_ref[...]).astype(o_ref.dtype)


# -------------------------------- wrapper ---------------------------------- #

def _round_up(x, m):
    return (x + m - 1) // m * m


def _pick_pack(dim):
    # Fold `pack` rows into the lane axis so the x/out last dim is a
    # lane-dense multiple of 128 (256 preferred for better MXU K/N fill).
    for lanes in (256, 128):
        if dim <= lanes and lanes % dim == 0:
            return lanes // dim
    return 1


def _block_diag(w, reps):
    # (a, b) -> (reps*a, reps*b) with `w` repeated on the block diagonal.
    if reps == 1:
        return w
    a, b = w.shape
    eye = jnp.eye(reps, dtype=w.dtype)
    return (eye[:, None, :, None] * w[None, :, None, :]).reshape(reps * a, reps * b)


def _pick_tile_rows(rows_p, cap):
    # rows_p / cap are in PACKED rows; cap is a multiple of 8.
    if rows_p < 16:
        return rows_p                                # single full-extent block
    if rows_p <= cap:
        return _round_up(pl.cdiv(rows_p, 2), 8)      # >=2 steps: pipelining / v7x 2-TC
    tile = cap
    if (pl.cdiv(rows_p, tile) % 2 and cap // 2 >= 8
            and pl.cdiv(rows_p, cap // 2) % 2 == 0):
        tile = cap // 2                              # keep the grid even for v7x
    return tile


def feedforward(x, w1, b1, w2, b2, *, tile_rows=None, mxu_dtype=jnp.bfloat16):
    """TabTransformer FeedForward forward pass.

    x : (batch, seq, dim)
    w1: (dim, 2*hidden), b1: (2*hidden,)   first Linear  (y = x @ W + b layout)
    w2: (hidden, dim),   b2: (dim,)        second Linear
    """
    batch, seq, dim = x.shape
    two_hidden = w1.shape[1]
    hidden = two_hidden // 2
    assert w1.shape == (dim, two_hidden)
    assert w2.shape == (hidden, dim)
    assert b1.shape == (two_hidden,) and b2.shape == (dim,)

    n_rows = batch * seq
    pack = _pick_pack(dim)

    x2d = x.reshape(n_rows, dim)
    pad = (-n_rows) % pack
    if pad:  # at most pack-1 rows; only when n_rows is not a multiple of pack
        x2d = jnp.pad(x2d, ((0, pad), (0, 0)))
    rows_tot = n_rows + pad
    rows_p = rows_tot // pack
    lanes = pack * dim
    xp = x2d.reshape(rows_p, lanes)        # free row-major reshape (same HBM bytes)

    # Wrapper-side block-diagonal weight expansion (tiny, one-off): keeps every
    # kernel operand lane-dense and removes any in-kernel relayout/reshape.
    #   h_packed[r, q*hidden + m]              = h_val [pack*r + q, m]
    #   h_packed[r, pack*hidden + q*hidden + m] = h_gate[pack*r + q, m]
    w1_val, w1_gate = w1[:, :hidden], w1[:, hidden:]
    w1p = jnp.concatenate(
        [_block_diag(w1_val, pack), _block_diag(w1_gate, pack)], axis=1
    ).astype(mxu_dtype)                                     # (pack*dim, 2*pack*hidden)
    w2p = _block_diag(w2, pack).astype(mxu_dtype)           # (pack*hidden, pack*dim)
    b1p = jnp.concatenate(
        [jnp.tile(b1[:hidden], pack), jnp.tile(b1[hidden:], pack)]
    ).reshape(1, 2 * pack * hidden).astype(jnp.float32)
    b2p = jnp.tile(b2, pack).reshape(1, lanes).astype(jnp.float32)

    half = pack * hidden

    if tile_rows is None:
        cap = max(8, _round_up(2048 // pack, 8))   # ~2048 original rows per tile
        tile_rows = _pick_tile_rows(rows_p, cap)
    assert tile_rows % 8 == 0 or tile_rows == rows_p, \
        "row tile must be a multiple of 8 sublanes or cover the full extent"
    grid = (pl.cdiv(rows_p, tile_rows),)           # partial final block is fine

    # VMEM footprint (lane-padded) with headroom; capped at 48 MiB (v7x-safe).
    def _lane(n):
        return _round_up(n, 128)

    x_item = jnp.dtype(x.dtype).itemsize
    w_item = jnp.dtype(mxu_dtype).itemsize
    est = (2 * 2 * tile_rows * _lane(lanes) * x_item                 # x/out dbl bufs
           + 2 * (lanes * _lane(2 * half) + half * _lane(lanes)) * w_item  # weights
           + 2 * (_lane(2 * half) + _lane(lanes)) * 4                # biases
           + tile_rows * _lane(2 * half) * 4                         # h intermediate
           + tile_rows * _lane(half) * 4)                            # GEGLU output
    vmem_limit = int(min(max(32 * 1024 * 1024, 2 * est), 48 * 1024 * 1024))

    out_p = pl.pallas_call(
        _feedforward_kernel,
        out_shape=jax.ShapeDtypeStruct((rows_p, lanes), x.dtype),
        grid_spec=pltpu.PrefetchScalarGridSpec(
            num_scalar_prefetch=0,
            grid=grid,
            in_specs=[
                pl.BlockSpec((tile_rows, lanes), lambda i: (i, 0)),   # x row tile
                pl.BlockSpec((lanes, 2 * half), lambda i: (0, 0)),    # W1 (resident)
                pl.BlockSpec((1, 2 * half), lambda i: (0, 0)),        # b1 (resident)
                pl.BlockSpec((half, lanes), lambda i: (0, 0)),        # W2 (resident)
                pl.BlockSpec((1, lanes), lambda i: (0, 0)),           # b2 (resident)
            ],
            out_specs=pl.BlockSpec((tile_rows, lanes), lambda i: (i, 0)),
        ),
        compiler_params=pltpu.CompilerParams(
            dimension_semantics=("parallel",),
            vmem_limit_bytes=vmem_limit,
        ),
    )(xp, w1p, b1p, w2p, b2p)

    out2d = out_p.reshape(rows_tot, dim)           # free row-major reshape
    if pad:
        out2d = out2d[:n_rows]
    return out2d.reshape(batch, seq, dim)


# ------------------------------- references -------------------------------- #

def feedforward_reference_f32(x2d, w1, b1, w2, b2):
    """Pure-JAX f32 reference matching the PyTorch module (exact erf GELU)."""
    h = x2d @ w1 + b1
    hidden = w2.shape[0]
    val, gates = h[:, :hidden], h[:, hidden:]
    y = val * jax.nn.gelu(gates, approximate=False)
    return y @ w2 + b2


def feedforward_reference_bf16(x2d, w1, b1, w2, b2, mxu_dtype=jnp.bfloat16):
    """Mirrors the kernel's bf16-MXU / f32-accumulate arithmetic (exact divide)."""
    h = jnp.dot(x2d.astype(mxu_dtype), w1.astype(mxu_dtype),
                preferred_element_type=jnp.float32) + b1
    hidden = w2.shape[0]
    val, gates = h[:, :hidden], h[:, hidden:]
    y = val * _gelu_exact(gates, lambda v: 1.0 / v)
    return jnp.dot(y.astype(mxu_dtype), w2.astype(mxu_dtype),
                   preferred_element_type=jnp.float32) + b2


# ----------------------------------- main ----------------------------------- #

if __name__ == "__main__":
    batch, seq, dim, mult = 2, 8, 32, 4
    hidden = dim * mult  # 128

    key = jax.random.PRNGKey(0)
    kx, kw1, kb1, kw2, kb2 = jax.random.split(key, 5)

    x = jax.random.normal(kx, (batch, seq, dim), dtype=jnp.float32)
    # Linear parameters in "x @ W + b" layout (i.e. PyTorch weight transposed).
    w1 = jax.random.normal(kw1, (dim, 2 * hidden), dtype=jnp.float32) / jnp.sqrt(dim)
    b1 = jax.random.normal(kb1, (2 * hidden,), dtype=jnp.float32) * 0.01
    w2 = jax.random.normal(kw2, (hidden, dim), dtype=jnp.float32) / jnp.sqrt(hidden)
    b2 = jax.random.normal(kb2, (dim,), dtype=jnp.float32) * 0.01

    out = jax.block_until_ready(feedforward(x, w1, b1, w2, b2))
    assert out.shape == (batch, seq, dim)

    x2d = x.reshape(-1, dim)

    # Structural check vs. a reference with the same bf16-MXU / f32-accumulate
    # arithmetic (catches chunk-order / bias / packing bugs); tolerance covers
    # the EUP approx-reciprocal in the in-kernel erf.
    ref_bf16 = feedforward_reference_bf16(x2d, w1, b1, w2, b2).reshape(batch, seq, dim)
    assert jnp.allclose(out, ref_bf16, atol=3e-2, rtol=3e-2), \
        float(jnp.max(jnp.abs(out - ref_bf16)))

    # Semantic check: close to the exact f32 PyTorch-equivalent forward
    # (drift comes from bf16 MXU operands; accumulation stays f32).
    ref_f32 = feedforward_reference_f32(x2d, w1, b1, w2, b2).reshape(batch, seq, dim)
    assert jnp.allclose(out, ref_f32, atol=1e-1, rtol=5e-2), \
        float(jnp.max(jnp.abs(out - ref_f32)))

    print("KERNEL_OK")
</pallas_src>

<mosaic_0001>
module attributes {stable_mosaic.version = 11 : i64} {
  func.func @_feedforward_kernel(%arg0: i32, %arg1: memref<2x256xf32, #tpu.memory_space<vmem>>, %arg2: memref<256x2048xbf16, #tpu.memory_space<vmem>>, %arg3: memref<1x2048xf32, #tpu.memory_space<vmem>>, %arg4: memref<1024x256xbf16, #tpu.memory_space<vmem>>, %arg5: memref<1x256xf32, #tpu.memory_space<vmem>>, %arg6: memref<2x256xf32, #tpu.memory_space<vmem>>) attributes {dimension_semantics = [#tpu.dimension_semantics<parallel>], iteration_bounds = array<i64: 1>, scalar_prefetch = 0 : i64, scratch_operands = 0 : i64, tpu.core_type = #tpu.core_type<tc>, window_params = [{transform_indices = @transform_0, window_bounds = array<i64: 2, 256>}, {pipeline_mode = #tpu.pipeline_mode<synchronous>, transform_indices = @transform_1, window_bounds = array<i64: 256, 2048>}, {pipeline_mode = #tpu.pipeline_mode<synchronous>, transform_indices = @transform_2, window_bounds = array<i64: 1, 2048>}, {pipeline_mode = #tpu.pipeline_mode<synchronous>, transform_indices = @transform_3, window_bounds = array<i64: 1024, 256>}, {pipeline_mode = #tpu.pipeline_mode<synchronous>, transform_indices = @transform_4, window_bounds = array<i64: 1, 256>}, {transform_indices = @transform_5, window_bounds = array<i64: 2, 256>}]} {
    %c0 = arith.constant 0 : index
    %c0_0 = arith.constant 0 : index
    %0 = vector.load %arg1[%c0, %c0_0] : memref<2x256xf32, #tpu.memory_space<vmem>>, vector<2x256xf32>
    %1 = arith.truncf %0 : vector<2x256xf32> to vector<2x256xbf16>
    %c0_1 = arith.constant 0 : index
    %c0_2 = arith.constant 0 : index
    %2 = vector.load %arg2[%c0_1, %c0_2] : memref<256x2048xbf16, #tpu.memory_space<vmem>>, vector<256x2048xbf16>
    %cst = arith.constant dense<0.000000e+00> : vector<2x2048xf32>
    %3 = tpu.matmul %1, %2, %cst {dimension_numbers = #tpu.dot_dimension_numbers<[1], [0], [0], [1], [0, 0, 1, 1], [], []>} : vector<2x256xbf16>, vector<256x2048xbf16>, vector<2x2048xf32> -> vector<2x2048xf32>
    %c0_3 = arith.constant 0 : index
    %c0_4 = arith.constant 0 : index
    %4 = vector.load %arg3[%c0_3, %c0_4] : memref<1x2048xf32, #tpu.memory_space<vmem>>, vector<1x2048xf32>
    %5 = vector.broadcast %4 : vector<1x2048xf32> to vector<2x2048xf32>
    %6 = arith.addf %3, %5 : vector<2x2048xf32>
    %7 = vector.extract_strided_slice %6 {offsets = [0, 0], sizes = [2, 1024], strides = [1, 1]} : vector<2x2048xf32> to vector<2x1024xf32>
    %8 = vector.extract_strided_slice %6 {offsets = [0, 1024], sizes = [2, 1024], strides = [1, 1]} : vector<2x2048xf32> to vector<2x1024xf32>
    %cst_5 = arith.constant 0.707106769 : f32
    %9 = vector.broadcast %cst_5 : f32 to vector<2x1024xf32>
    %10 = arith.mulf %8, %9 : vector<2x1024xf32>
    %cst_6 = arith.constant 0.000000e+00 : f32
    %11 = vector.broadcast %cst_6 : f32 to vector<2x1024xf32>
    %12 = arith.cmpf oge, %10, %11 : vector<2x1024xf32>
    %cst_7 = arith.constant 1.000000e+00 : f32
    %cst_8 = arith.constant -1.000000e+00 : f32
    %13 = vector.broadcast %cst_7 : f32 to vector<2x1024xf32>
    %14 = vector.broadcast %cst_8 : f32 to vector<2x1024xf32>
    %15 = arith.select %12, %13, %14 : vector<2x1024xi1>, vector<2x1024xf32>
    %16 = math.absf %10 : vector<2x1024xf32>
    %cst_9 = arith.constant 0.327591091 : f32
    %17 = vector.broadcast %cst_9 : f32 to vector<2x1024xf32>
    %18 = arith.mulf %17, %16 : vector<2x1024xf32>
    %cst_10 = arith.constant 1.000000e+00 : f32
    %19 = vector.broadcast %cst_10 : f32 to vector<2x1024xf32>
    %20 = arith.addf %19, %18 : vector<2x1024xf32>
    %21 = tpu.reciprocal %20 {approx = true} : vector<2x1024xf32> -> vector<2x1024xf32>
    %cst_11 = arith.constant 1.06140542 : f32
    %22 = vector.broadcast %cst_11 : f32 to vector<2x1024xf32>
    %23 = arith.mulf %22, %21 : vector<2x1024xf32>
    %cst_12 = arith.constant -1.45315206 : f32
    %24 = vector.broadcast %cst_12 : f32 to vector<2x1024xf32>
    %25 = arith.addf %23, %24 : vector<2x1024xf32>
    %26 = arith.mulf %25, %21 : vector<2x1024xf32>
    %cst_13 = arith.constant 1.42141378 : f32
    %27 = vector.broadcast %cst_13 : f32 to vector<2x1024xf32>
    %28 = arith.addf %26, %27 : vector<2x1024xf32>
    %29 = arith.mulf %28, %21 : vector<2x1024xf32>
    %cst_14 = arith.constant -0.284496725 : f32
    %30 = vector.broadcast %cst_14 : f32 to vector<2x1024xf32>
    %31 = arith.addf %29, %30 : vector<2x1024xf32>
    %32 = arith.mulf %31, %21 : vector<2x1024xf32>
    %cst_15 = arith.constant 0.254829586 : f32
    %33 = vector.broadcast %cst_15 : f32 to vector<2x1024xf32>
    %34 = arith.addf %32, %33 : vector<2x1024xf32>
    %35 = arith.mulf %34, %21 : vector<2x1024xf32>
    %cst_16 = arith.constant 0.000000e+00 : f32
    %36 = vector.broadcast %cst_16 : f32 to vector<2x1024xf32>
    %37 = arith.subf %36, %16 : vector<2x1024xf32>
    %38 = arith.mulf %37, %16 : vector<2x1024xf32>
    %39 = math.exp %38 : vector<2x1024xf32>
    %40 = arith.mulf %35, %39 : vector<2x1024xf32>
    %cst_17 = arith.constant 1.000000e+00 : f32
    %41 = vector.broadcast %cst_17 : f32 to vector<2x1024xf32>
    %42 = arith.subf %41, %40 : vector<2x1024xf32>
    %43 = arith.mulf %15, %42 : vector<2x1024xf32>
    %cst_18 = arith.constant 5.000000e-01 : f32
    %44 = vector.broadcast %cst_18 : f32 to vector<2x1024xf32>
    %45 = arith.mulf %44, %8 : vector<2x1024xf32>
    %cst_19 = arith.constant 1.000000e+00 : f32
    %46 = vector.broadcast %cst_19 : f32 to vector<2x1024xf32>
    %47 = arith.addf %46, %43 : vector<2x1024xf32>
    %48 = arith.mulf %45, %47 : vector<2x1024xf32>
    %49 = arith.mulf %7, %48 : vector<2x1024xf32>
    %50 = arith.truncf %49 : vector<2x1024xf32> to vector<2x1024xbf16>
    %c0_20 = arith.constant 0 : index
    %c0_21 = arith.constant 0 : index
    %51 = vector.load %arg4[%c0_20, %c0_21] : memref<1024x256xbf16, #tpu.memory_space<vmem>>, vector<1024x256xbf16>
    %cst_22 = arith.constant dense<0.000000e+00> : vector<2x256xf32>
    %52 = tpu.matmul %50, %51, %cst_22 {dimension_numbers = #tpu.dot_dimension_numbers<[1], [0], [0], [1], [0, 0, 1, 1], [], []>} : vector<2x1024xbf16>, vector<1024x256xbf16>, vector<2x256xf32> -> vector<2x256xf32>
    %c0_23 = arith.constant 0 : index
    %c0_24 = arith.constant 0 : index
    %53 = vector.load %arg5[%c0_23, %c0_24] : memref<1x256xf32, #tpu.memory_space<vmem>>, vector<1x256xf32>
    %54 = vector.broadcast %53 : vector<1x256xf32> to vector<2x256xf32>
    %55 = arith.addf %52, %54 : vector<2x256xf32>
    %c0_25 = arith.constant 0 : index
    %c0_26 = arith.constant 0 : index
    %56 = vector.load %arg6[%c0_25, %c0_26] : memref<2x256xf32, #tpu.memory_space<vmem>>, vector<2x256xf32>
    tpu.vector_store %arg6[%c0_25, %c0_26], %55 {strides = array<i32>} : memref<2x256xf32, #tpu.memory_space<vmem>>, vector<2x256xf32>,
    return
  }
  func.func @transform_0(%arg0: i32) -> (i32, i32) {
    %c0_i32 = arith.constant 0 : i32
    %c0_i32_0 = arith.constant 0 : i32
    return %arg0, %c0_i32 : i32, i32
  }
  func.func @transform_1(%arg0: i32) -> (i32, i32) {
    %c0_i32 = arith.constant 0 : i32
    %c0_i32_0 = arith.constant 0 : i32
    %c0_i32_1 = arith.constant 0 : i32
    return %c0_i32, %c0_i32_0 : i32, i32
  }
  func.func @transform_2(%arg0: i32) -> (i32, i32) {
    %c0_i32 = arith.constant 0 : i32
    %c0_i32_0 = arith.constant 0 : i32
    %c0_i32_1 = arith.constant 0 : i32
    return %c0_i32, %c0_i32_0 : i32, i32
  }
  func.func @transform_3(%arg0: i32) -> (i32, i32) {
    %c0_i32 = arith.constant 0 : i32
    %c0_i32_0 = arith.constant 0 : i32
    %c0_i32_1 = arith.constant 0 : i32
    return %c0_i32, %c0_i32_0 : i32, i32
  }
  func.func @transform_4(%arg0: i32) -> (i32, i32) {
    %c0_i32 = arith.constant 0 : i32
    %c0_i32_0 = arith.constant 0 : i32
    %c0_i32_1 = arith.constant 0 : i32
    return %c0_i32, %c0_i32_0 : i32, i32
  }
  func.func @transform_5(%arg0: i32) -> (i32, i32) {
    %c0_i32 = arith.constant 0 : i32
    %c0_i32_0 = arith.constant 0 : i32
    return %arg0, %c0_i32 : i32, i32
  }
}

</mosaic_0001>

<bundles_post_ra>
// kernel: tpu_custom_call.1
= control target key start
LH: loop header
LB: loop body
LE: loop exit
PB: predicated region body
PF: predicated region fallthrough
CT: control target
= control target key end

     0   :  { %10 = vsyncpa [#allocation3], 0  ;;  %s4237_s0 = inlined_call_operand.hbm [shape: f32[2,256], index: 0, kind: input, shape index: {}]   ;;  %s4238_s1 = inlined_call_operand.hbm [shape: bf16[256,2048], index: 1, kind: input, shape index: {}]   ;;  %s4239_s2 = inlined_call_operand.hbm [shape: f32[1,2048], index: 2, kind: input, shape index: {}]   ;;  %s4240_s3 = inlined_call_operand.hbm [shape: bf16[1024,256], index: 3, kind: input, shape index: {}]   ;;  %s4241_s4 = inlined_call_operand.vmem [shape: f32[1,256], index: 4, kind: input, shape index: {}]   ;;  %s4242_s5 = inlined_call_operand.hbm [shape: f32[2,256], index: 5, kind: output, shape index: {}]  }
   0x1   :  { %11 = vsyncpa [#allocation6], 0 }
   0x2   :  { %12 = vsyncpa [#allocation9], 0 }
   0x3   :  { %13 = vsyncpa [#allocation4], 0  ;;  %s3959_s18 = smov [#allocation5]  }
   0x4   :  { %s29_s19 = sshll.u32 %s3959_s18, 4  ;;  %s30_s19 = int_to_ptr.vmem [resolvable:$true] %s29_s19 }
   0x5   :  { %s3859_s20 = scalar_lea.vmem %s30_s19, 32768  ;;  %p3864_p1 = scmp.lt.s32.totalorder %s30_s19, %s30_s19 }
   0x6   :  { %p3860_p0 = scmp.ne.s32.totalorder %s30_s19, %s3859_s20  ;;  %p3865_p2 = scmp.lt.s32.totalorder %s3859_s20, %s3859_s20 }
   0x8   :  { %p3866_p3 = por %p3865_p2, %p3864_p1 }
   0xa   :  { %p3867_p4 = pnand %p3866_p3, %p3860_p0 }
   0xc   :  { %3870 = shalt.err (!%p3867_p4)
}
   0xd   :  { %s3960_s21 = smov 1024   ;;  %s3961_s22 = smov 64  }
   0xe   :  { %35 = dma.hbm_to_vmem [thread:$0]  %s4238_s1, 32768, %s30_s19, [#allocation6], %s3960_s21, %s3960_s21, %s3961_s22  }
   0xf   :  { %s3962_s25 = smov [#allocation2]   ;;  %s3963_s27 = smov [#allocation7]  }
  0x10   :  { %s20_s26 = sshll.u32 %s3962_s25, 4  ;;  %s42_s28 = sshll.u32 %s3963_s27, 4  ;;  %s21_s26 = int_to_ptr.vmem [resolvable:$true] %s20_s26  ;;  %s43_s28 = int_to_ptr.vmem [resolvable:$true] %s42_s28 }
  0x11   :  { %s3879_s29 = scalar_lea.vmem %s21_s26, 64  ;;  %p3884_p6 = scmp.lt.s32.totalorder %s21_s26, %s21_s26 }
  0x12   :  { %p3880_p5 = scmp.ne.s32.totalorder %s21_s26, %s3879_s29  ;;  %p3885_p7 = scmp.lt.s32.totalorder %s3879_s29, %s3879_s29 }
  0x14   :  { %p3886_p8 = por %p3885_p7, %p3884_p6 }
  0x16   :  { %p3887_p9 = pnand %p3886_p8, %p3880_p5 }
  0x18   :  { %3890 = shalt.err (!%p3887_p9)
}
  0x19   :  { %23 = dma.hbm_to_vmem [thread:$0]  %s4237_s0, 64, %s21_s26, [#allocation3]  }
  0x1a   :  { %s3899_s7 = scalar_lea.vmem %s43_s28, 256  ;;  %p3904_p11 = scmp.lt.s32.totalorder %s43_s28, %s43_s28 }
  0x1b   :  { %p3900_p10 = scmp.ne.s32.totalorder %s43_s28, %s3899_s7  ;;  %p3905_p12 = scmp.lt.s32.totalorder %s3899_s7, %s3899_s7 }
  0x1d   :  { %p3906_p13 = por %p3905_p12, %p3904_p11 }
  0x1f   :  { %p3907_p0 = pnand %p3906_p13, %p3900_p10 }
  0x21   :  { %3910 = shalt.err (!%p3907_p0)
}
  0x22   :  { %45 = dma.hbm_to_vmem [thread:$0]  %s4239_s2, 256, %s43_s28, [#allocation6]  }
  0x23   :  { %s3964_s9 = smov [#allocation8]  }
  0x24   :  { %s51_s10 = sshll.u32 %s3964_s9, 4  ;;  %s52_s10 = int_to_ptr.vmem [resolvable:$true] %s51_s10 }
  0x25   :  { %s3919_s11 = scalar_lea.vmem %s52_s10, 16384  ;;  %p3924_p2 = scmp.lt.s32.totalorder %s52_s10, %s52_s10 }
  0x26   :  { %p3920_p1 = scmp.ne.s32.totalorder %s52_s10, %s3919_s11  ;;  %p3925_p3 = scmp.lt.s32.totalorder %s3919_s11, %s3919_s11 }
  0x28   :  { %p3926_p4 = por %p3925_p3, %p3924_p2 }
  0x2a   :  { %p3927_p5 = pnand %p3926_p4, %p3920_p1 }
  0x2c   :  { %3930 = shalt.err (!%p3927_p5)
}
  0x2d   :  { %s3965_s0 = smov 128   ;;  %s3966_s12 = smov 8  }
  0x2e   :  { %57 = dma.hbm_to_vmem [thread:$0]  %s4240_s3, 16384, %s52_s10, [#allocation9], %s3965_s0, %s3965_s0, %s3966_s12  }
  0x2f   :  { %3951 = dma.done.wait [#allocation3], 64  }
  0x30   :  { %3952 = vsyncadd [#allocation3], 4294967232 }
  0x31   :  { %3953 = dma.done.wait [#allocation6], 33024  }
  0x32   :  { %3954 = vsyncadd [#allocation6], 4294934272 }
  0x33   :  { %3955 = dma.done.wait [#allocation9], 16384  }
  0x34   :  { %3956 = vsyncadd [#allocation9], 4294950912  ;;  %v198_v0 = vld [vmem:[#allocation5 + $0x380] sm:$0xff]  ;;  %v199_v2 = vld [vmem:[#allocation5 + $0x388] sm:$0xff]  ;;  %s3968_s15 = smov [#allocation10]  }
  0x35   :  { %v206_v1 = vld [vmem:[#allocation5 + $0x3c0] sm:$0xff]  ;;  %v207_v4 = vld [vmem:[#allocation5 + $0x3c8] sm:$0xff]  ;;  %v4011_v53 = vld.sshfl [vmem:[#allocation2] sm:$0x33 pattern:$0x76325410] }
  0x36   :  { %v3345_v3 = vcombine.high %v198_v0, %v206_v1  ;;  %v3344_v5 = vcombine.low %v198_v0, %v206_v1  ;;  %v182_v6 = vld [vmem:[#allocation5 + $0x300] sm:$0xff]  ;;  %v3347_v8 = vcombine.high %v199_v2, %v207_v4  ;;  %v3346_v9 = vcombine.low %v199_v2, %v207_v4  ;;  %v183_v11 = vld [vmem:[#allocation5 + $0x308] sm:$0xff]  ;;  %s3220_s16 = sshll.u32 %s3968_s15, 4  ;;  %s3221_s16 = int_to_ptr.vmem [resolvable:$true] %s3220_s16 }
  0x37   :  { %v190_v7 = vld [vmem:[#allocation5 + $0x340] sm:$0xff]  ;;  %v191_v12 = vld [vmem:[#allocation5 + $0x348] sm:$0xff]  ;;  %v81_v57 = vcombine.high %v4011_v53, %v4011_v53  ;;  %p3936_p7 = scmp.lt.s32.totalorder %s3221_s16, %s3221_s16 }
  0x38   :  { %v3329_v10 = vcombine.high %v182_v6, %v190_v7  ;;  %v166_v13 = vld [vmem:[#allocation5 + $0x280] sm:$0xff]  ;;  %1706 = vmatprep.subr.bf16.mxu0 %v3345_v3  ;;  %v3331_v14 = vcombine.high %v183_v11, %v191_v12  ;;  %v167_v16 = vld [vmem:[#allocation5 + $0x288] sm:$0xff]  ;;  %1747 = vmatprep.subr.bf16.mxu1 %v3347_v8  ;;  %v3328_v18 = vcombine.low %v182_v6, %v190_v7 }
  0x39   :  { %v174_v15 = vld [vmem:[#allocation5 + $0x2c0] sm:$0xff]  ;;  %v175_v17 = vld [vmem:[#allocation5 + $0x2c8] sm:$0xff]  ;;  %1707 = vmatpush1.bf16.msra.mxu0 %v3344_v5  ;;  %1748 = vmatpush1.bf16.msra.mxu1 %v3346_v9  ;;  %v3330_v19 = vcombine.low %v183_v11, %v191_v12  ;;  %v4015_v61 = vpack.c.bf16 %v81_v57, %v81_v57 }
  0x3a   :  { %1708 = vmatprep.subr.bf16.mxu0 %v3329_v10  ;;  %v3313_v20 = vcombine.high %v166_v13, %v174_v15  ;;  %1749 = vmatprep.subr.bf16.mxu1 %v3331_v14  ;;  %v3315_v21 = vcombine.high %v167_v16, %v175_v17  ;;  %v150_v22 = vld [vmem:[#allocation5 + $0x200] sm:$0xff]  ;;  %v151_v24 = vld [vmem:[#allocation5 + $0x208] sm:$0xff]  ;;  %v3312_v26 = vcombine.low %v166_v13, %v174_v15 }
  0x3b   :  { %v158_v23 = vld [vmem:[#allocation5 + $0x240] sm:$0xff]  ;;  %v159_v25 = vld [vmem:[#allocation5 + $0x248] sm:$0xff]  ;;  %v3314_v27 = vcombine.low %v167_v16, %v175_v17  ;;  %1738 = vmatprep.mubr.bf16.mxu0 %v4015_v61  ;;  %1779 = vmatprep.mubr.bf16.mxu1 %v4015_v61 }
  0x3c   :  { %v3297_v28 = vcombine.high %v150_v22, %v158_v23  ;;  %v3299_v29 = vcombine.high %v151_v24, %v159_v25  ;;  %v134_v30 = vld [vmem:[#allocation5 + $0x180] sm:$0xff]  ;;  %v135_v32 = vld [vmem:[#allocation5 + $0x188] sm:$0xff]  ;;  %v3296_v34 = vcombine.low %v150_v22, %v158_v23  ;;  %v3298_v35 = vcombine.low %v151_v24, %v159_v25 }
  0x3d   :  { %1709 = vmatpush1.bf16.msra.mxu0 %v3328_v18  ;;  %1750 = vmatpush1.bf16.msra.mxu1 %v3330_v19  ;;  %v142_v31 = vld [vmem:[#allocation5 + $0x1c0] sm:$0xff]  ;;  %v143_v33 = vld [vmem:[#allocation5 + $0x1c8] sm:$0xff] }
  0x3e   :  { %1710 = vmatprep.subr.bf16.mxu0 %v3313_v20  ;;  %1751 = vmatprep.subr.bf16.mxu1 %v3315_v21  ;;  %v3281_v36 = vcombine.high %v134_v30, %v142_v31  ;;  %v3283_v37 = vcombine.high %v135_v32, %v143_v33  ;;  %v118_v38 = vld [vmem:[#allocation5 + $0x100] sm:$0xff]  ;;  %v119_v40 = vld [vmem:[#allocation5 + $0x108] sm:$0xff]  ;;  %v3280_v42 = vcombine.low %v134_v30, %v142_v31 }
  0x3f   :  { %v126_v39 = vld [vmem:[#allocation5 + $0x140] sm:$0xff]  ;;  %v127_v41 = vld [vmem:[#allocation5 + $0x148] sm:$0xff]  ;;  %v3282_v43 = vcombine.low %v135_v32, %v143_v33 }
  0x40   :  { %v3265_v44 = vcombine.high %v118_v38, %v126_v39  ;;  %v3267_v45 = vcombine.high %v119_v40, %v127_v41  ;;  %v102_v46 = vld [vmem:[#allocation5 + $0x80] sm:$0xff]  ;;  %v103_v48 = vld [vmem:[#allocation5 + $0x88] sm:$0xff]  ;;  %v3264_v50 = vcombine.low %v118_v38, %v126_v39  ;;  %v3266_v51 = vcombine.low %v119_v40, %v127_v41 }
  0x41   :  { %1711 = vmatpush1.bf16.msra.mxu0 %v3312_v26  ;;  %1752 = vmatpush1.bf16.msra.mxu1 %v3314_v27  ;;  %v110_v47 = vld [vmem:[#allocation5 + $0xc0] sm:$0xff]  ;;  %v111_v49 = vld [vmem:[#allocation5 + $0xc8] sm:$0xff] }
  0x42   :  { %1712 = vmatprep.subr.bf16.mxu0 %v3297_v28  ;;  %1753 = vmatprep.subr.bf16.mxu1 %v3299_v29  ;;  %v3249_v52 = vcombine.high %v102_v46, %v110_v47  ;;  %v3251_v54 = vcombine.high %v103_v48, %v111_v49  ;;  %v86_v55 = vld [vmem:[#allocation5] sm:$0xff]  ;;  %v87_v58 = vld [vmem:[#allocation5 + $0x8] sm:$0xff]  ;;  %v3248_v60 = vcombine.low %v102_v46, %v110_v47 }
  0x43   :  { %v94_v56 = vld [vmem:[#allocation5 + $0x40] sm:$0xff]  ;;  %v95_v59 = vld [vmem:[#allocation5 + $0x48] sm:$0xff]  ;;  %v3250_v62 = vcombine.low %v103_v48, %v111_v49 }
  0x44   :  { %v3233_v63 = vcombine.high %v86_v55, %v94_v56  ;;  %v3235_v0 = vcombine.high %v87_v58, %v95_v59  ;;  %v326_v1 = vld [vmem:[#allocation5 + $0x780] sm:$0xff]  ;;  %v327_v3 = vld [vmem:[#allocation5 + $0x788] sm:$0xff]  ;;  %v3232_v5 = vcombine.low %v86_v55, %v94_v56  ;;  %v3234_v6 = vcombine.low %v87_v58, %v95_v59 }
  0x45   :  { %1713 = vmatpush1.bf16.msra.mxu0 %v3296_v34  ;;  %1754 = vmatpush1.bf16.msra.mxu1 %v3298_v35  ;;  %v334_v2 = vld [vmem:[#allocation5 + $0x7c0] sm:$0xff]  ;;  %v335_v4 = vld [vmem:[#allocation5 + $0x7c8] sm:$0xff] }
  0x46   :  { %1714 = vmatprep.subr.bf16.mxu0 %v3281_v36  ;;  %1755 = vmatprep.subr.bf16.mxu1 %v3283_v37  ;;  %v3473_v7 = vcombine.high %v326_v1, %v334_v2  ;;  %v3475_v8 = vcombine.high %v327_v3, %v335_v4  ;;  %v310_v9 = vld [vmem:[#allocation5 + $0x700] sm:$0xff]  ;;  %v311_v11 = vld [vmem:[#allocation5 + $0x708] sm:$0xff]  ;;  %v3472_v13 = vcombine.low %v326_v1, %v334_v2 }
  0x47   :  { %v318_v10 = vld [vmem:[#allocation5 + $0x740] sm:$0xff]  ;;  %v319_v12 = vld [vmem:[#allocation5 + $0x748] sm:$0xff]  ;;  %v3474_v14 = vcombine.low %v327_v3, %v335_v4  ;;  %v200_v3 = vld [vmem:[#allocation5 + $0x390] sm:$0xff] }
  0x48   :  { %v3457_v15 = vcombine.high %v310_v9, %v318_v10  ;;  %v3459_v16 = vcombine.high %v311_v11, %v319_v12  ;;  %v294_v17 = vld [vmem:[#allocation5 + $0x680] sm:$0xff]  ;;  %v295_v19 = vld [vmem:[#allocation5 + $0x688] sm:$0xff]  ;;  %v3456_v21 = vcombine.low %v310_v9, %v318_v10  ;;  %v3458_v22 = vcombine.low %v311_v11, %v319_v12  ;;  %v208_v4 = vld [vmem:[#allocation5 + $0x3d0] sm:$0xff] }
  0x49   :  { %1715 = vmatpush1.bf16.msra.mxu0 %v3280_v42  ;;  %1756 = vmatpush1.bf16.msra.mxu1 %v3282_v43  ;;  %v302_v18 = vld [vmem:[#allocation5 + $0x6c0] sm:$0xff]  ;;  %v303_v20 = vld [vmem:[#allocation5 + $0x6c8] sm:$0xff]  ;;  %v3349_v9 = vcombine.high %v200_v3, %v208_v4  ;;  %v184_v11 = vld [vmem:[#allocation5 + $0x310] sm:$0xff] }
  0x4a   :  { %1716 = vmatprep.subr.bf16.mxu0 %v3265_v44  ;;  %1757 = vmatprep.subr.bf16.mxu1 %v3267_v45  ;;  %v3441_v23 = vcombine.high %v294_v17, %v302_v18  ;;  %v3443_v24 = vcombine.high %v295_v19, %v303_v20  ;;  %v278_v25 = vld [vmem:[#allocation5 + $0x600] sm:$0xff]  ;;  %v279_v27 = vld [vmem:[#allocation5 + $0x608] sm:$0xff]  ;;  %v3440_v29 = vcombine.low %v294_v17, %v302_v18  ;;  %v192_v12 = vld [vmem:[#allocation5 + $0x350] sm:$0xff] }
  0x4b   :  { %v286_v26 = vld [vmem:[#allocation5 + $0x640] sm:$0xff]  ;;  %v287_v28 = vld [vmem:[#allocation5 + $0x648] sm:$0xff]  ;;  %v3442_v30 = vcombine.low %v295_v19, %v303_v20  ;;  %v3333_v18 = vcombine.high %v184_v11, %v192_v12  ;;  %v168_v19 = vld [vmem:[#allocation5 + $0x290] sm:$0xff] }
  0x4c   :  { %v3425_v31 = vcombine.high %v278_v25, %v286_v26  ;;  %v3427_v32 = vcombine.high %v279_v27, %v287_v28  ;;  %v262_v33 = vld [vmem:[#allocation5 + $0x580] sm:$0xff]  ;;  %v263_v35 = vld [vmem:[#allocation5 + $0x588] sm:$0xff]  ;;  %v3424_v37 = vcombine.low %v278_v25, %v286_v26  ;;  %v3426_v38 = vcombine.low %v279_v27, %v287_v28  ;;  %v176_v20 = vld [vmem:[#allocation5 + $0x2d0] sm:$0xff] }
  0x4d   :  { %1717 = vmatpush1.bf16.msra.mxu0 %v3264_v50  ;;  %1758 = vmatpush1.bf16.msra.mxu1 %v3266_v51  ;;  %v270_v34 = vld [vmem:[#allocation5 + $0x5c0] sm:$0xff]  ;;  %v271_v36 = vld [vmem:[#allocation5 + $0x5c8] sm:$0xff]  ;;  %v3317_v25 = vcombine.high %v168_v19, %v176_v20  ;;  %v152_v26 = vld [vmem:[#allocation5 + $0x210] sm:$0xff] }
  0x4e   :  { %1718 = vmatprep.subr.bf16.mxu0 %v3249_v52  ;;  %1759 = vmatprep.subr.bf16.mxu1 %v3251_v54  ;;  %v3409_v39 = vcombine.high %v262_v33, %v270_v34  ;;  %v3411_v40 = vcombine.high %v263_v35, %v271_v36  ;;  %v246_v41 = vld [vmem:[#allocation5 + $0x500] sm:$0xff]  ;;  %v247_v43 = vld [vmem:[#allocation5 + $0x508] sm:$0xff]  ;;  %v3408_v45 = vcombine.low %v262_v33, %v270_v34  ;;  %v160_v27 = vld [vmem:[#allocation5 + $0x250] sm:$0xff] }
  0x4f   :  { %v254_v42 = vld [vmem:[#allocation5 + $0x540] sm:$0xff]  ;;  %v255_v44 = vld [vmem:[#allocation5 + $0x548] sm:$0xff]  ;;  %v3410_v46 = vcombine.low %v263_v35, %v271_v36  ;;  %v153_v28 = vld [vmem:[#allocation5 + $0x218] sm:$0xff]  ;;  %v3301_v33 = vcombine.high %v152_v26, %v160_v27 }
  0x50   :  { %v3393_v47 = vcombine.high %v246_v41, %v254_v42  ;;  %v3395_v48 = vcombine.high %v247_v43, %v255_v44  ;;  %v230_v49 = vld [vmem:[#allocation5 + $0x480] sm:$0xff]  ;;  %v231_v51 = vld [vmem:[#allocation5 + $0x488] sm:$0xff]  ;;  %v3392_v54 = vcombine.low %v246_v41, %v254_v42  ;;  %v3394_v55 = vcombine.low %v247_v43, %v255_v44  ;;  %v136_v34 = vld [vmem:[#allocation5 + $0x190] sm:$0xff] }
  0x51   :  { %1719 = vmatpush1.bf16.msra.mxu0 %v3248_v60  ;;  %1760 = vmatpush1.bf16.msra.mxu1 %v3250_v62  ;;  %v238_v50 = vld [vmem:[#allocation5 + $0x4c0] sm:$0xff]  ;;  %v239_v52 = vld [vmem:[#allocation5 + $0x4c8] sm:$0xff]  ;;  %v144_v35 = vld [vmem:[#allocation5 + $0x1d0] sm:$0xff] }
  0x52   :  { %1720 = vmatprep.subr.bf16.mxu0 %v3233_v63  ;;  %1761 = vmatprep.subr.bf16.mxu1 %v3235_v0  ;;  %v3377_v56 = vcombine.high %v230_v49, %v238_v50  ;;  %v3379_v57 = vcombine.high %v231_v51, %v239_v52  ;;  %v214_v58 = vld [vmem:[#allocation5 + $0x400] sm:$0xff]  ;;  %v215_v60 = vld [vmem:[#allocation5 + $0x408] sm:$0xff]  ;;  %v3376_v63 = vcombine.low %v230_v49, %v238_v50  ;;  %v137_v36 = vld [vmem:[#allocation5 + $0x198] sm:$0xff] }
  0x53   :  { %v222_v59 = vld [vmem:[#allocation5 + $0x440] sm:$0xff]  ;;  %v223_v62 = vld [vmem:[#allocation5 + $0x448] sm:$0xff]  ;;  %v3378_v0 = vcombine.low %v231_v51, %v239_v52  ;;  %v3285_v41 = vcombine.high %v136_v34, %v144_v35  ;;  %v120_v42 = vld [vmem:[#allocation5 + $0x110] sm:$0xff] }
  0x54   :  { %v3361_v1 = vcombine.high %v214_v58, %v222_v59  ;;  %v3363_v2 = vcombine.high %v215_v60, %v223_v62  ;;  %v128_v43 = vld [vmem:[#allocation5 + $0x150] sm:$0xff]  ;;  %v121_v44 = vld [vmem:[#allocation5 + $0x118] sm:$0xff] }
  0x55   :  { %1721 = vmatpush1.bf16.msra.mxu0 %v3232_v5  ;;  %1762 = vmatpush1.bf16.msra.mxu1 %v3234_v6  ;;  %v201_v5 = vld [vmem:[#allocation5 + $0x398] sm:$0xff]  ;;  %v3269_v49 = vcombine.high %v120_v42, %v128_v43  ;;  %v104_v50 = vld [vmem:[#allocation5 + $0x90] sm:$0xff] }
  0x56   :  { %1722 = vmatprep.subr.bf16.mxu0 %v3473_v7  ;;  %1763 = vmatprep.subr.bf16.mxu1 %v3475_v8  ;;  %v209_v6 = vld [vmem:[#allocation5 + $0x3d8] sm:$0xff]  ;;  %v3360_v7 = vcombine.low %v214_v58, %v222_v59  ;;  %v3362_v8 = vcombine.low %v215_v60, %v223_v62  ;;  %v112_v51 = vld [vmem:[#allocation5 + $0xd0] sm:$0xff] }
  0x57   :  { %v3351_v10 = vcombine.high %v201_v5, %v209_v6  ;;  %v3350_v17 = vcombine.low %v201_v5, %v209_v6  ;;  %v105_v52 = vld [vmem:[#allocation5 + $0x98] sm:$0xff]  ;;  %v3253_v58 = vcombine.high %v104_v50, %v112_v51  ;;  %v88_v59 = vld [vmem:[#allocation5 + $0x10] sm:$0xff] }
  0x58   :  { %v96_v60 = vld [vmem:[#allocation5 + $0x50] sm:$0xff]  ;;  %v89_v62 = vld [vmem:[#allocation5 + $0x18] sm:$0xff] }
  0x59   :  { %1723 = vmatpush2.bf16.msra.mxu0 %v3472_v13  ;;  %1764 = vmatpush2.bf16.msra.mxu1 %v3474_v14  ;;  %v4021_v13 = vpack.c.bf16 %v4011_v53, %v4011_v53  ;;  %v185_v14 = vld [vmem:[#allocation5 + $0x318] sm:$0xff]  ;;  %v3332_v53 = vcombine.low %v184_v11, %v192_v12  ;;  %v336_v5 = vld [vmem:[#allocation5 + $0x7d0] sm:$0xff] }
  0x5a   :  { %1724 = vmatprep.subr.bf16.mxu0 %v3457_v15  ;;  %1765 = vmatprep.subr.bf16.mxu1 %v3459_v16  ;;  %v193_v15 = vld [vmem:[#allocation5 + $0x358] sm:$0xff]  ;;  %v3348_v16 = vcombine.low %v200_v3, %v208_v4  ;;  %v3237_v3 = vcombine.high %v88_v59, %v96_v60  ;;  %v328_v4 = vld [vmem:[#allocation5 + $0x790] sm:$0xff] }
  0x5b   :  { %v329_v6 = vld [vmem:[#allocation5 + $0x798] sm:$0xff]  ;;  %v3477_v11 = vcombine.high %v328_v4, %v336_v5  ;;  %v312_v12 = vld [vmem:[#allocation5 + $0x710] sm:$0xff] }
  0x5d   :  { %1725 = vmatpush2.bf16.msra.mxu0 %v3456_v21  ;;  %1766 = vmatpush2.bf16.msra.mxu1 %v3458_v22  ;;  %v169_v21 = vld [vmem:[#allocation5 + $0x298] sm:$0xff]  ;;  %v3335_v22 = vcombine.high %v185_v14, %v193_v15 }
  0x5e   :  { %1726 = vmatprep.subr.bf16.mxu0 %v3441_v23  ;;  %1767 = vmatprep.subr.bf16.mxu1 %v3443_v24  ;;  %v177_v23 = vld [vmem:[#allocation5 + $0x2d8] sm:$0xff]  ;;  %v3334_v24 = vcombine.low %v185_v14, %v193_v15  ;;  %v320_v14 = vld [vmem:[#allocation5 + $0x750] sm:$0xff] }
  0x5f   :  { %v313_v15 = vld [vmem:[#allocation5 + $0x718] sm:$0xff] }
  0x61   :  { %1727 = vmatpush2.bf16.msra.mxu0 %v3440_v29  ;;  %1768 = vmatpush2.bf16.msra.mxu1 %v3442_v30  ;;  %v3319_v29 = vcombine.high %v169_v21, %v177_v23  ;;  %v161_v30 = vld [vmem:[#allocation5 + $0x258] sm:$0xff] }
  0x62   :  { %1728 = vmatprep.subr.bf16.mxu0 %v3425_v31  ;;  %1769 = vmatprep.subr.bf16.mxu1 %v3427_v32  ;;  %v3316_v31 = vcombine.low %v168_v19, %v176_v20  ;;  %v3318_v32 = vcombine.low %v169_v21, %v177_v23  ;;  %v3461_v20 = vcombine.high %v312_v12, %v320_v14  ;;  %v296_v21 = vld [vmem:[#allocation5 + $0x690] sm:$0xff]  ;;  %v297_v23 = vld [vmem:[#allocation5 + $0x698] sm:$0xff] }
  0x65   :  { %1729 = vmatpush2.bf16.msra.mxu0 %v3424_v37  ;;  %1770 = vmatpush2.bf16.msra.mxu1 %v3426_v38  ;;  %v3303_v37 = vcombine.high %v153_v28, %v161_v30  ;;  %v145_v38 = vld [vmem:[#allocation5 + $0x1d8] sm:$0xff] }
  0x66   :  { %1730 = vmatprep.subr.bf16.mxu0 %v3409_v39  ;;  %1771 = vmatprep.subr.bf16.mxu1 %v3411_v40  ;;  %v3300_v39 = vcombine.low %v152_v26, %v160_v27  ;;  %v3302_v40 = vcombine.low %v153_v28, %v161_v30  ;;  %v280_v28 = vld [vmem:[#allocation5 + $0x610] sm:$0xff]  ;;  %v281_v30 = vld [vmem:[#allocation5 + $0x618] sm:$0xff] }
  0x69   :  { %1731 = vmatpush2.bf16.msra.mxu0 %v3408_v45  ;;  %1772 = vmatpush2.bf16.msra.mxu1 %v3410_v46  ;;  %v3287_v45 = vcombine.high %v137_v36, %v145_v38  ;;  %v129_v46 = vld [vmem:[#allocation5 + $0x158] sm:$0xff] }
  0x6a   :  { %1732 = vmatprep.subr.bf16.mxu0 %v3393_v47  ;;  %1773 = vmatprep.subr.bf16.mxu1 %v3395_v48  ;;  %v3284_v47 = vcombine.low %v136_v34, %v144_v35  ;;  %v3286_v48 = vcombine.low %v137_v36, %v145_v38  ;;  %v264_v36 = vld [vmem:[#allocation5 + $0x590] sm:$0xff]  ;;  %v265_v38 = vld [vmem:[#allocation5 + $0x598] sm:$0xff] }
  0x6d   :  { %1733 = vmatpush2.bf16.msra.mxu0 %v3392_v54  ;;  %1774 = vmatpush2.bf16.msra.mxu1 %v3394_v55  ;;  %v3271_v54 = vcombine.high %v121_v44, %v129_v46  ;;  %v113_v55 = vld [vmem:[#allocation5 + $0xd8] sm:$0xff] }
  0x6e   :  { %1734 = vmatprep.subr.bf16.mxu0 %v3377_v56  ;;  %1775 = vmatprep.subr.bf16.mxu1 %v3379_v57  ;;  %v3268_v56 = vcombine.low %v120_v42, %v128_v43  ;;  %v3270_v57 = vcombine.low %v121_v44, %v129_v46  ;;  %v248_v44 = vld [vmem:[#allocation5 + $0x510] sm:$0xff]  ;;  %v249_v46 = vld [vmem:[#allocation5 + $0x518] sm:$0xff] }
  0x71   :  { %1735 = vmatpush2.bf16.msra.mxu0 %v3376_v63  ;;  %1776 = vmatpush2.bf16.msra.mxu1 %v3378_v0  ;;  %v3255_v63 = vcombine.high %v105_v52, %v113_v55  ;;  %v97_v0 = vld [vmem:[#allocation5 + $0x58] sm:$0xff] }
  0x72   :  { %1736 = vmatprep.subr.bf16.mxu0 %v3361_v1  ;;  %1777 = vmatprep.subr.bf16.mxu1 %v3363_v2  ;;  %v3252_v1 = vcombine.low %v104_v50, %v112_v51  ;;  %v3254_v2 = vcombine.low %v105_v52, %v113_v55  ;;  %v232_v52 = vld [vmem:[#allocation5 + $0x490] sm:$0xff]  ;;  %v233_v55 = vld [vmem:[#allocation5 + $0x498] sm:$0xff] }
  0x75   :  { %1737 = vmatpush2.bf16.msra.mxu0 %v3360_v7  ;;  %1778 = vmatpush2.bf16.msra.mxu1 %v3362_v8  ;;  %v3239_v7 = vcombine.high %v89_v62, %v97_v0  ;;  %v337_v8 = vld [vmem:[#allocation5 + $0x7d8] sm:$0xff] }
  0x76   :  { %1788 = vmatprep.subr.bf16.mxu0 %v3349_v9  ;;  %1829 = vmatprep.subr.bf16.mxu1 %v3351_v10  ;;  %v3236_v9 = vcombine.low %v88_v59, %v96_v60  ;;  %v3238_v10 = vcombine.low %v89_v62, %v97_v0  ;;  %v3478_v19 = vcombine.low %v329_v6, %v337_v8  ;;  %v216_v62 = vld [vmem:[#allocation5 + $0x410] sm:$0xff]  ;;  %v217_v0 = vld [vmem:[#allocation5 + $0x418] sm:$0xff] }
  0x78   :  { %1739 = vmatmul.mubr.bf16.vlgmr.msra.gmra.mxu0 %v4021_v13  ;;  %1780 = vmatmul.mubr.bf16.vlgmr.msra.gmra.mxu1 %v4021_v13 }
  0x79   :  { %1789 = vmatpush1.bf16.msra.mxu0 %v3348_v16  ;;  %1830 = vmatpush1.bf16.msra.mxu1 %v3350_v17  ;;  %v3479_v16 = vcombine.high %v329_v6, %v337_v8  ;;  %v321_v17 = vld [vmem:[#allocation5 + $0x758] sm:$0xff]  ;;  %v202_v6 = vld [vmem:[#allocation5 + $0x3a0] sm:$0xff]  ;;  %v203_v8 = vld [vmem:[#allocation5 + $0x3a8] sm:$0xff] }
  0x7a   :  { %1790 = vmatprep.subr.bf16.mxu0 %v3333_v18  ;;  %1831 = vmatprep.subr.bf16.mxu1 %v3335_v22  ;;  %v3476_v18 = vcombine.low %v328_v4, %v336_v5  ;;  %v304_v22 = vld [vmem:[#allocation5 + $0x6d0] sm:$0xff]  ;;  %v3462_v26 = vcombine.low %v313_v15, %v321_v17 }
  0x7b   :  { %1820 = vmatprep.mubr.bf16.mxu0 %v4015_v61  ;;  %1861 = vmatprep.mubr.bf16.mxu1 %v4015_v61  ;;  %v3445_v27 = vcombine.high %v296_v21, %v304_v22 }
  0x7d   :  { %1791 = vmatpush1.bf16.msra.mxu0 %v3332_v53  ;;  %1832 = vmatpush1.bf16.msra.mxu1 %v3334_v24  ;;  %v3463_v53 = vcombine.high %v313_v15, %v321_v17  ;;  %v305_v24 = vld [vmem:[#allocation5 + $0x6d8] sm:$0xff]  ;;  %v186_v15 = vld [vmem:[#allocation5 + $0x320] sm:$0xff]  ;;  %v187_v17 = vld [vmem:[#allocation5 + $0x328] sm:$0xff] }
  0x7e   :  { %1792 = vmatprep.subr.bf16.mxu0 %v3317_v25  ;;  %1833 = vmatprep.subr.bf16.mxu1 %v3319_v29  ;;  %v3460_v25 = vcombine.low %v312_v12, %v320_v14  ;;  %v288_v29 = vld [vmem:[#allocation5 + $0x650] sm:$0xff]  ;;  %v3446_v34 = vcombine.low %v297_v23, %v305_v24 }
  0x7f   :  { %v3429_v35 = vcombine.high %v280_v28, %v288_v29 }
  0x81   :  { %1793 = vmatpush1.bf16.msra.mxu0 %v3316_v31  ;;  %1834 = vmatpush1.bf16.msra.mxu1 %v3318_v32  ;;  %v3447_v31 = vcombine.high %v297_v23, %v305_v24  ;;  %v289_v32 = vld [vmem:[#allocation5 + $0x658] sm:$0xff]  ;;  %v178_v24 = vld [vmem:[#allocation5 + $0x2e0] sm:$0xff] }
  0x82   :  { %1794 = vmatprep.subr.bf16.mxu0 %v3301_v33  ;;  %1835 = vmatprep.subr.bf16.mxu1 %v3303_v37  ;;  %v3444_v33 = vcombine.low %v296_v21, %v304_v22  ;;  %v272_v37 = vld [vmem:[#allocation5 + $0x5d0] sm:$0xff]  ;;  %v3430_v42 = vcombine.low %v281_v30, %v289_v32 }
  0x83   :  { %v3413_v43 = vcombine.high %v264_v36, %v272_v37 }
  0x85   :  { %1795 = vmatpush1.bf16.msra.mxu0 %v3300_v39  ;;  %1836 = vmatpush1.bf16.msra.mxu1 %v3302_v40  ;;  %v3431_v39 = vcombine.high %v281_v30, %v289_v32  ;;  %v273_v40 = vld [vmem:[#allocation5 + $0x5d8] sm:$0xff]  ;;  %v162_v32 = vld [vmem:[#allocation5 + $0x260] sm:$0xff] }
  0x86   :  { %1796 = vmatprep.subr.bf16.mxu0 %v3285_v41  ;;  %1837 = vmatprep.subr.bf16.mxu1 %v3287_v45  ;;  %v3428_v41 = vcombine.low %v280_v28, %v288_v29  ;;  %v256_v45 = vld [vmem:[#allocation5 + $0x550] sm:$0xff]  ;;  %v3414_v50 = vcombine.low %v265_v38, %v273_v40 }
  0x87   :  { %v3397_v51 = vcombine.high %v248_v44, %v256_v45 }
  0x89   :  { %1797 = vmatpush1.bf16.msra.mxu0 %v3284_v47  ;;  %1838 = vmatpush1.bf16.msra.mxu1 %v3286_v48  ;;  %v3415_v47 = vcombine.high %v265_v38, %v273_v40  ;;  %v257_v48 = vld [vmem:[#allocation5 + $0x558] sm:$0xff]  ;;  %v146_v40 = vld [vmem:[#allocation5 + $0x1e0] sm:$0xff] }
  0x8a   :  { %1798 = vmatprep.subr.bf16.mxu0 %v3269_v49  ;;  %1839 = vmatprep.subr.bf16.mxu1 %v3271_v54  ;;  %v3412_v49 = vcombine.low %v264_v36, %v272_v37  ;;  %v240_v54 = vld [vmem:[#allocation5 + $0x4d0] sm:$0xff]  ;;  %v3398_v59 = vcombine.low %v249_v46, %v257_v48 }
  0x8b   :  { %v3381_v60 = vcombine.high %v232_v52, %v240_v54 }
  0x8d   :  { %1799 = vmatpush1.bf16.msra.mxu0 %v3268_v56  ;;  %1840 = vmatpush1.bf16.msra.mxu1 %v3270_v57  ;;  %v3399_v56 = vcombine.high %v249_v46, %v257_v48  ;;  %v241_v57 = vld [vmem:[#allocation5 + $0x4d8] sm:$0xff]  ;;  %v130_v48 = vld [vmem:[#allocation5 + $0x160] sm:$0xff] }
  0x8e   :  { %1800 = vmatprep.subr.bf16.mxu0 %v3253_v58  ;;  %1841 = vmatprep.subr.bf16.mxu1 %v3255_v63  ;;  %v3396_v58 = vcombine.low %v248_v44, %v256_v45  ;;  %v224_v63 = vld [vmem:[#allocation5 + $0x450] sm:$0xff]  ;;  %v3382_v4 = vcombine.low %v233_v55, %v241_v57 }
  0x8f   :  { %v3365_v5 = vcombine.high %v216_v62, %v224_v63 }
  0x91   :  { %1801 = vmatpush1.bf16.msra.mxu0 %v3252_v1  ;;  %1842 = vmatpush1.bf16.msra.mxu1 %v3254_v2  ;;  %v3383_v1 = vcombine.high %v233_v55, %v241_v57  ;;  %v225_v2 = vld [vmem:[#allocation5 + $0x458] sm:$0xff]  ;;  %v114_v57 = vld [vmem:[#allocation5 + $0xe0] sm:$0xff] }
  0x92   :  { %1802 = vmatprep.subr.bf16.mxu0 %v3237_v3  ;;  %1843 = vmatprep.subr.bf16.mxu1 %v3239_v7  ;;  %v3380_v3 = vcombine.low %v232_v52, %v240_v54  ;;  %v210_v7 = vld [vmem:[#allocation5 + $0x3e0] sm:$0xff]  ;;  %v3366_v12 = vcombine.low %v217_v0, %v225_v2 }
  0x93   :  { %v3353_v14 = vcombine.high %v202_v6, %v210_v7 }
  0x95   :  { %1803 = vmatpush1.bf16.msra.mxu0 %v3236_v9  ;;  %1844 = vmatpush1.bf16.msra.mxu1 %v3238_v10  ;;  %v3367_v9 = vcombine.high %v217_v0, %v225_v2  ;;  %v211_v10 = vld [vmem:[#allocation5 + $0x3e8] sm:$0xff]  ;;  %v98_v2 = vld [vmem:[#allocation5 + $0x60] sm:$0xff] }
  0x96   :  { %1804 = vmatprep.subr.bf16.mxu0 %v3477_v11  ;;  %1845 = vmatprep.subr.bf16.mxu1 %v3479_v16  ;;  %v3364_v11 = vcombine.low %v216_v62, %v224_v63  ;;  %v194_v16 = vld [vmem:[#allocation5 + $0x360] sm:$0xff]  ;;  %v3354_v21 = vcombine.low %v203_v8, %v211_v10 }
  0x97   :  { %v3337_v22 = vcombine.high %v186_v15, %v194_v16 }
  0x99   :  { %1805 = vmatpush2.bf16.msra.mxu0 %v3476_v18  ;;  %1846 = vmatpush2.bf16.msra.mxu1 %v3478_v19  ;;  %v3355_v18 = vcombine.high %v203_v8, %v211_v10  ;;  %v195_v19 = vld [vmem:[#allocation5 + $0x368] sm:$0xff]  ;;  %v338_v10 = vld [vmem:[#allocation5 + $0x7e0] sm:$0xff] }
  0x9a   :  { %1806 = vmatprep.subr.bf16.mxu0 %v3461_v20  ;;  %1847 = vmatprep.subr.bf16.mxu1 %v3463_v53  ;;  %v3352_v20 = vcombine.low %v202_v6, %v210_v7  ;;  %v3339_v23 = vcombine.high %v187_v17, %v195_v19  ;;  %v170_v53 = vld [vmem:[#allocation5 + $0x2a0] sm:$0xff]  ;;  %v3338_v28 = vcombine.low %v187_v17, %v195_v19 }
  0x9b   :  { %v3321_v29 = vcombine.high %v170_v53, %v178_v24  ;;  %v322_v19 = vld [vmem:[#allocation5 + $0x760] sm:$0xff] }
  0x9d   :  { %1807 = vmatpush2.bf16.msra.mxu0 %v3460_v25  ;;  %1848 = vmatpush2.bf16.msra.mxu1 %v3462_v26  ;;  %v171_v25 = vld [vmem:[#allocation5 + $0x2a8] sm:$0xff] }
  0x9e   :  { %1808 = vmatprep.subr.bf16.mxu0 %v3445_v27  ;;  %1849 = vmatprep.subr.bf16.mxu1 %v3447_v31  ;;  %v179_v26 = vld [vmem:[#allocation5 + $0x2e8] sm:$0xff]  ;;  %v3336_v27 = vcombine.low %v186_v15, %v194_v16  ;;  %v154_v31 = vld [vmem:[#allocation5 + $0x220] sm:$0xff] }
  0x9f   :  { %v3323_v30 = vcombine.high %v171_v25, %v179_v26  ;;  %v3322_v36 = vcombine.low %v171_v25, %v179_v26  ;;  %v3305_v37 = vcombine.high %v154_v31, %v162_v32  ;;  %v298_v25 = vld [vmem:[#allocation5 + $0x6a0] sm:$0xff] }
  0xa0   :  { %v306_v26 = vld [vmem:[#allocation5 + $0x6e0] sm:$0xff] }
  0xa1   :  { %1809 = vmatpush2.bf16.msra.mxu0 %v3444_v33  ;;  %1850 = vmatpush2.bf16.msra.mxu1 %v3446_v34  ;;  %v155_v33 = vld [vmem:[#allocation5 + $0x228] sm:$0xff] }
  0xa2   :  { %1810 = vmatprep.subr.bf16.mxu0 %v3429_v35  ;;  %1851 = vmatprep.subr.bf16.mxu1 %v3431_v39  ;;  %v163_v34 = vld [vmem:[#allocation5 + $0x268] sm:$0xff]  ;;  %v3320_v35 = vcombine.low %v170_v53, %v178_v24  ;;  %v138_v39 = vld [vmem:[#allocation5 + $0x1a0] sm:$0xff] }
  0xa3   :  { %v3307_v38 = vcombine.high %v155_v33, %v163_v34  ;;  %v3306_v44 = vcombine.low %v155_v33, %v163_v34  ;;  %v3289_v45 = vcombine.high %v138_v39, %v146_v40  ;;  %v282_v33 = vld [vmem:[#allocation5 + $0x620] sm:$0xff] }
  0xa4   :  { %v290_v34 = vld [vmem:[#allocation5 + $0x660] sm:$0xff] }
  0xa5   :  { %1811 = vmatpush2.bf16.msra.mxu0 %v3428_v41  ;;  %1852 = vmatpush2.bf16.msra.mxu1 %v3430_v42  ;;  %v139_v41 = vld [vmem:[#allocation5 + $0x1a8] sm:$0xff] }
  0xa6   :  { %1812 = vmatprep.subr.bf16.mxu0 %v3413_v43  ;;  %1853 = vmatprep.subr.bf16.mxu1 %v3415_v47  ;;  %v147_v42 = vld [vmem:[#allocation5 + $0x1e8] sm:$0xff]  ;;  %v3304_v43 = vcombine.low %v154_v31, %v162_v32  ;;  %v122_v47 = vld [vmem:[#allocation5 + $0x120] sm:$0xff]  ;;  %v3449_v31 = vcombine.high %v298_v25, %v306_v26 }
  0xa7   :  { %v3291_v46 = vcombine.high %v139_v41, %v147_v42  ;;  %v3290_v52 = vcombine.low %v139_v41, %v147_v42  ;;  %v3273_v54 = vcombine.high %v122_v47, %v130_v48  ;;  %v266_v41 = vld [vmem:[#allocation5 + $0x5a0] sm:$0xff] }
  0xa8   :  { %v274_v42 = vld [vmem:[#allocation5 + $0x5e0] sm:$0xff] }
  0xa9   :  { %1813 = vmatpush2.bf16.msra.mxu0 %v3412_v49  ;;  %1854 = vmatpush2.bf16.msra.mxu1 %v3414_v50  ;;  %v123_v49 = vld [vmem:[#allocation5 + $0x128] sm:$0xff] }
  0xaa   :  { %1814 = vmatprep.subr.bf16.mxu0 %v3397_v51  ;;  %1855 = vmatprep.subr.bf16.mxu1 %v3399_v56  ;;  %v131_v50 = vld [vmem:[#allocation5 + $0x168] sm:$0xff]  ;;  %v3288_v51 = vcombine.low %v138_v39, %v146_v40  ;;  %v106_v56 = vld [vmem:[#allocation5 + $0xa0] sm:$0xff]  ;;  %v3433_v39 = vcombine.high %v282_v33, %v290_v34 }
  0xab   :  { %v3275_v55 = vcombine.high %v123_v49, %v131_v50  ;;  %v3274_v62 = vcombine.low %v123_v49, %v131_v50  ;;  %v3257_v63 = vcombine.high %v106_v56, %v114_v57  ;;  %v250_v49 = vld [vmem:[#allocation5 + $0x520] sm:$0xff] }
  0xac   :  { %v258_v50 = vld [vmem:[#allocation5 + $0x560] sm:$0xff] }
  0xad   :  { %1815 = vmatpush2.bf16.msra.mxu0 %v3396_v58  ;;  %1856 = vmatpush2.bf16.msra.mxu1 %v3398_v59  ;;  %v107_v58 = vld [vmem:[#allocation5 + $0xa8] sm:$0xff] }
  0xae   :  { %1816 = vmatprep.subr.bf16.mxu0 %v3381_v60  ;;  %1857 = vmatprep.subr.bf16.mxu1 %v3383_v1  ;;  %v115_v59 = vld [vmem:[#allocation5 + $0xe8] sm:$0xff]  ;;  %v3272_v60 = vcombine.low %v122_v47, %v130_v48  ;;  %v90_v1 = vld [vmem:[#allocation5 + $0x20] sm:$0xff]  ;;  %v3417_v47 = vcombine.high %v266_v41, %v274_v42 }
  0xaf   :  { %v3259_v0 = vcombine.high %v107_v58, %v115_v59  ;;  %v3258_v6 = vcombine.low %v107_v58, %v115_v59  ;;  %v3241_v7 = vcombine.high %v90_v1, %v98_v2  ;;  %v234_v58 = vld [vmem:[#allocation5 + $0x4a0] sm:$0xff] }
  0xb0   :  { %v242_v59 = vld [vmem:[#allocation5 + $0x4e0] sm:$0xff] }
  0xb1   :  { %1817 = vmatpush2.bf16.msra.mxu0 %v3380_v3  ;;  %1858 = vmatpush2.bf16.msra.mxu1 %v3382_v4  ;;  %v91_v3 = vld [vmem:[#allocation5 + $0x28] sm:$0xff] }
  0xb2   :  { %1818 = vmatprep.subr.bf16.mxu0 %v3365_v5  ;;  %1859 = vmatprep.subr.bf16.mxu1 %v3367_v9  ;;  %v99_v4 = vld [vmem:[#allocation5 + $0x68] sm:$0xff]  ;;  %v3256_v5 = vcombine.low %v106_v56, %v114_v57  ;;  %v330_v9 = vld [vmem:[#allocation5 + $0x7a0] sm:$0xff]  ;;  %v3401_v56 = vcombine.high %v250_v49, %v258_v50 }
  0xb3   :  { %v3243_v8 = vcombine.high %v91_v3, %v99_v4  ;;  %v3242_v15 = vcombine.low %v91_v3, %v99_v4  ;;  %v3481_v16 = vcombine.high %v330_v9, %v338_v10  ;;  %v218_v3 = vld [vmem:[#allocation5 + $0x420] sm:$0xff] }
  0xb4   :  { %v226_v4 = vld [vmem:[#allocation5 + $0x460] sm:$0xff] }
  0xb5   :  { %1819 = vmatpush2.bf16.msra.mxu0 %v3364_v11  ;;  %1860 = vmatpush2.bf16.msra.mxu1 %v3366_v12  ;;  %v331_v11 = vld [vmem:[#allocation5 + $0x7a8] sm:$0xff] }
  0xb6   :  { %1870 = vmatprep.subr.bf16.mxu0 %v3353_v14  ;;  %1911 = vmatprep.subr.bf16.mxu1 %v3355_v18  ;;  %v339_v12 = vld [vmem:[#allocation5 + $0x7e8] sm:$0xff]  ;;  %v3240_v14 = vcombine.low %v90_v1, %v98_v2  ;;  %v314_v18 = vld [vmem:[#allocation5 + $0x720] sm:$0xff]  ;;  %v3385_v1 = vcombine.high %v234_v58, %v242_v59 }
  0xb7   :  { %v3483_v17 = vcombine.high %v331_v11, %v339_v12  ;;  %v3465_v53 = vcombine.high %v314_v18, %v322_v19 }
  0xb8   :  { %1821 = vmatmul.mubr.bf16.vlgmr.msra.gmra.mxu0 %v4021_v13  ;;  %1862 = vmatmul.mubr.bf16.vlgmr.msra.gmra.mxu1 %v4021_v13 }
  0xb9   :  { %1871 = vmatpush1.bf16.msra.mxu0 %v3352_v20  ;;  %1912 = vmatpush1.bf16.msra.mxu1 %v3354_v21  ;;  %v315_v20 = vld [vmem:[#allocation5 + $0x728] sm:$0xff] }
  0xba   :  { %1872 = vmatprep.subr.bf16.mxu0 %v3337_v22  ;;  %1913 = vmatprep.subr.bf16.mxu1 %v3339_v23  ;;  %v323_v21 = vld [vmem:[#allocation5 + $0x768] sm:$0xff]  ;;  %v3480_v22 = vcombine.low %v330_v9, %v338_v10  ;;  %v3482_v23 = vcombine.low %v331_v11, %v339_v12  ;;  %v3369_v9 = vcombine.high %v218_v3, %v226_v4  ;;  %v204_v11 = vld [vmem:[#allocation5 + $0x3b0] sm:$0xff] }
  0xbb   :  { %1902 = vmatprep.mubr.bf16.mxu0 %v4015_v61  ;;  %1943 = vmatprep.mubr.bf16.mxu1 %v4015_v61  ;;  %v3467_v24 = vcombine.high %v315_v20, %v323_v21  ;;  %v212_v12 = vld [vmem:[#allocation5 + $0x3f0] sm:$0xff] }
  0xbd   :  { %1873 = vmatpush1.bf16.msra.mxu0 %v3336_v27  ;;  %1914 = vmatpush1.bf16.msra.mxu1 %v3338_v28  ;;  %v299_v27 = vld [vmem:[#allocation5 + $0x6a8] sm:$0xff] }
  0xbe   :  { %1874 = vmatprep.subr.bf16.mxu0 %v3321_v29  ;;  %1915 = vmatprep.subr.bf16.mxu1 %v3323_v30  ;;  %v307_v28 = vld [vmem:[#allocation5 + $0x6e8] sm:$0xff]  ;;  %v3464_v29 = vcombine.low %v314_v18, %v322_v19  ;;  %v3466_v30 = vcombine.low %v315_v20, %v323_v21  ;;  %v3357_v18 = vcombine.high %v204_v11, %v212_v12  ;;  %v188_v20 = vld [vmem:[#allocation5 + $0x330] sm:$0xff] }
  0xbf   :  { %v3451_v32 = vcombine.high %v299_v27, %v307_v28  ;;  %v196_v21 = vld [vmem:[#allocation5 + $0x370] sm:$0xff] }
  0xc1   :  { %1875 = vmatpush1.bf16.msra.mxu0 %v3320_v35  ;;  %1916 = vmatpush1.bf16.msra.mxu1 %v3322_v36  ;;  %v283_v35 = vld [vmem:[#allocation5 + $0x628] sm:$0xff] }
  0xc2   :  { %1876 = vmatprep.subr.bf16.mxu0 %v3305_v37  ;;  %1917 = vmatprep.subr.bf16.mxu1 %v3307_v38  ;;  %v291_v36 = vld [vmem:[#allocation5 + $0x668] sm:$0xff]  ;;  %v3448_v37 = vcombine.low %v298_v25, %v306_v26  ;;  %v3450_v38 = vcombine.low %v299_v27, %v307_v28  ;;  %v3341_v25 = vcombine.high %v188_v20, %v196_v21  ;;  %v172_v27 = vld [vmem:[#allocation5 + $0x2b0] sm:$0xff] }
  0xc3   :  { %v3435_v40 = vcombine.high %v283_v35, %v291_v36  ;;  %v180_v28 = vld [vmem:[#allocation5 + $0x2f0] sm:$0xff] }
  0xc5   :  { %1877 = vmatpush1.bf16.msra.mxu0 %v3304_v43  ;;  %1918 = vmatpush1.bf16.msra.mxu1 %v3306_v44  ;;  %v267_v43 = vld [vmem:[#allocation5 + $0x5a8] sm:$0xff] }
  0xc6   :  { %1878 = vmatprep.subr.bf16.mxu0 %v3289_v45  ;;  %1919 = vmatprep.subr.bf16.mxu1 %v3291_v46  ;;  %v275_v44 = vld [vmem:[#allocation5 + $0x5e8] sm:$0xff]  ;;  %v3432_v45 = vcombine.low %v282_v33, %v290_v34  ;;  %v3434_v46 = vcombine.low %v283_v35, %v291_v36  ;;  %v3325_v33 = vcombine.high %v172_v27, %v180_v28  ;;  %v156_v35 = vld [vmem:[#allocation5 + $0x230] sm:$0xff] }
  0xc7   :  { %v3419_v48 = vcombine.high %v267_v43, %v275_v44  ;;  %v164_v36 = vld [vmem:[#allocation5 + $0x270] sm:$0xff] }
  0xc9   :  { %1879 = vmatpush1.bf16.msra.mxu0 %v3288_v51  ;;  %1920 = vmatpush1.bf16.msra.mxu1 %v3290_v52  ;;  %v251_v51 = vld [vmem:[#allocation5 + $0x528] sm:$0xff] }
  0xca   :  { %1880 = vmatprep.subr.bf16.mxu0 %v3273_v54  ;;  %1921 = vmatprep.subr.bf16.mxu1 %v3275_v55  ;;  %v259_v52 = vld [vmem:[#allocation5 + $0x568] sm:$0xff]  ;;  %v3416_v54 = vcombine.low %v266_v41, %v274_v42  ;;  %v3418_v55 = vcombine.low %v267_v43, %v275_v44  ;;  %v3309_v41 = vcombine.high %v156_v35, %v164_v36  ;;  %v140_v43 = vld [vmem:[#allocation5 + $0x1b0] sm:$0xff] }
  0xcb   :  { %v3403_v57 = vcombine.high %v251_v51, %v259_v52  ;;  %v148_v44 = vld [vmem:[#allocation5 + $0x1f0] sm:$0xff] }
  0xcd   :  { %1881 = vmatpush1.bf16.msra.mxu0 %v3272_v60  ;;  %1922 = vmatpush1.bf16.msra.mxu1 %v3274_v62  ;;  %v235_v60 = vld [vmem:[#allocation5 + $0x4a8] sm:$0xff] }
  0xce   :  { %1882 = vmatprep.subr.bf16.mxu0 %v3257_v63  ;;  %1923 = vmatprep.subr.bf16.mxu1 %v3259_v0  ;;  %v243_v62 = vld [vmem:[#allocation5 + $0x4e8] sm:$0xff]  ;;  %v3400_v63 = vcombine.low %v250_v49, %v258_v50  ;;  %v3402_v0 = vcombine.low %v251_v51, %v259_v52  ;;  %v3293_v49 = vcombine.high %v140_v43, %v148_v44  ;;  %v124_v50 = vld [vmem:[#allocation5 + $0x130] sm:$0xff]  ;;  %v125_v52 = vld [vmem:[#allocation5 + $0x138] sm:$0xff] }
  0xcf   :  { %v3387_v2 = vcombine.high %v235_v60, %v243_v62  ;;  %v132_v51 = vld [vmem:[#allocation5 + $0x170] sm:$0xff] }
  0xd1   :  { %1883 = vmatpush1.bf16.msra.mxu0 %v3256_v5  ;;  %1924 = vmatpush1.bf16.msra.mxu1 %v3258_v6  ;;  %v219_v5 = vld [vmem:[#allocation5 + $0x428] sm:$0xff] }
  0xd2   :  { %1884 = vmatprep.subr.bf16.mxu0 %v3241_v7  ;;  %1925 = vmatprep.subr.bf16.mxu1 %v3243_v8  ;;  %v227_v6 = vld [vmem:[#allocation5 + $0x468] sm:$0xff]  ;;  %v3384_v7 = vcombine.low %v234_v58, %v242_v59  ;;  %v3386_v8 = vcombine.low %v235_v60, %v243_v62  ;;  %v108_v59 = vld [vmem:[#allocation5 + $0xb0] sm:$0xff]  ;;  %v109_v62 = vld [vmem:[#allocation5 + $0xb8] sm:$0xff] }
  0xd3   :  { %v3371_v10 = vcombine.high %v219_v5, %v227_v6  ;;  %v116_v60 = vld [vmem:[#allocation5 + $0xf0] sm:$0xff] }
  0xd5   :  { %1885 = vmatpush1.bf16.msra.mxu0 %v3240_v14  ;;  %1926 = vmatpush1.bf16.msra.mxu1 %v3242_v15  ;;  %v205_v14 = vld [vmem:[#allocation5 + $0x3b8] sm:$0xff] }
  0xd6   :  { %1886 = vmatprep.subr.bf16.mxu0 %v3481_v16  ;;  %1927 = vmatprep.subr.bf16.mxu1 %v3483_v17  ;;  %v213_v15 = vld [vmem:[#allocation5 + $0x3f8] sm:$0xff]  ;;  %v3368_v16 = vcombine.low %v218_v3, %v226_v4  ;;  %v3370_v17 = vcombine.low %v219_v5, %v227_v6  ;;  %v92_v4 = vld [vmem:[#allocation5 + $0x30] sm:$0xff] }
  0xd7   :  { %v3359_v19 = vcombine.high %v205_v14, %v213_v15  ;;  %v100_v5 = vld [vmem:[#allocation5 + $0x70] sm:$0xff]  ;;  %v93_v6 = vld [vmem:[#allocation5 + $0x38] sm:$0xff] }
  0xd9   :  { %1887 = vmatpush2.bf16.msra.mxu0 %v3480_v22  ;;  %1928 = vmatpush2.bf16.msra.mxu1 %v3482_v23  ;;  %v189_v22 = vld [vmem:[#allocation5 + $0x338] sm:$0xff] }
  0xda   :  { %1888 = vmatprep.subr.bf16.mxu0 %v3465_v53  ;;  %1929 = vmatprep.subr.bf16.mxu1 %v3467_v24  ;;  %v197_v23 = vld [vmem:[#allocation5 + $0x378] sm:$0xff]  ;;  %v3356_v53 = vcombine.low %v204_v11, %v212_v12  ;;  %v3358_v24 = vcombine.low %v205_v14, %v213_v15  ;;  %v332_v12 = vld [vmem:[#allocation5 + $0x7b0] sm:$0xff] }
  0xdb   :  { %v3343_v26 = vcombine.high %v189_v22, %v197_v23  ;;  %v340_v14 = vld [vmem:[#allocation5 + $0x7f0] sm:$0xff]  ;;  %v333_v15 = vld [vmem:[#allocation5 + $0x7b8] sm:$0xff] }
  0xdd   :  { %1889 = vmatpush2.bf16.msra.mxu0 %v3464_v29  ;;  %1930 = vmatpush2.bf16.msra.mxu1 %v3466_v30  ;;  %v173_v29 = vld [vmem:[#allocation5 + $0x2b8] sm:$0xff] }
  0xde   :  { %1890 = vmatprep.subr.bf16.mxu0 %v3449_v31  ;;  %1931 = vmatprep.subr.bf16.mxu1 %v3451_v32  ;;  %v181_v30 = vld [vmem:[#allocation5 + $0x2f8] sm:$0xff]  ;;  %v3340_v31 = vcombine.low %v188_v20, %v196_v21  ;;  %v3342_v32 = vcombine.low %v189_v22, %v197_v23  ;;  %v316_v21 = vld [vmem:[#allocation5 + $0x730] sm:$0xff] }
  0xdf   :  { %v3327_v34 = vcombine.high %v173_v29, %v181_v30  ;;  %v324_v22 = vld [vmem:[#allocation5 + $0x770] sm:$0xff]  ;;  %v317_v23 = vld [vmem:[#allocation5 + $0x738] sm:$0xff] }
  0xe1   :  { %1891 = vmatpush2.bf16.msra.mxu0 %v3448_v37  ;;  %1932 = vmatpush2.bf16.msra.mxu1 %v3450_v38  ;;  %v157_v37 = vld [vmem:[#allocation5 + $0x238] sm:$0xff] }
  0xe2   :  { %1892 = vmatprep.subr.bf16.mxu0 %v3433_v39  ;;  %1933 = vmatprep.subr.bf16.mxu1 %v3435_v40  ;;  %v165_v38 = vld [vmem:[#allocation5 + $0x278] sm:$0xff]  ;;  %v3324_v39 = vcombine.low %v172_v27, %v180_v28  ;;  %v3326_v40 = vcombine.low %v173_v29, %v181_v30  ;;  %v300_v28 = vld [vmem:[#allocation5 + $0x6b0] sm:$0xff] }
  0xe3   :  { %v3311_v42 = vcombine.high %v157_v37, %v165_v38  ;;  %v308_v29 = vld [vmem:[#allocation5 + $0x6f0] sm:$0xff]  ;;  %v301_v30 = vld [vmem:[#allocation5 + $0x6b8] sm:$0xff] }
  0xe5   :  { %1893 = vmatpush2.bf16.msra.mxu0 %v3432_v45  ;;  %1934 = vmatpush2.bf16.msra.mxu1 %v3434_v46  ;;  %v141_v45 = vld [vmem:[#allocation5 + $0x1b8] sm:$0xff] }
  0xe6   :  { %1894 = vmatprep.subr.bf16.mxu0 %v3417_v47  ;;  %1935 = vmatprep.subr.bf16.mxu1 %v3419_v48  ;;  %v149_v46 = vld [vmem:[#allocation5 + $0x1f8] sm:$0xff]  ;;  %v3308_v47 = vcombine.low %v156_v35, %v164_v36  ;;  %v3310_v48 = vcombine.low %v157_v37, %v165_v38  ;;  %v284_v36 = vld [vmem:[#allocation5 + $0x630] sm:$0xff] }
  0xe7   :  { %v292_v37 = vld [vmem:[#allocation5 + $0x670] sm:$0xff]  ;;  %v285_v38 = vld [vmem:[#allocation5 + $0x638] sm:$0xff] }
  0xe9   :  { %1895 = vmatpush2.bf16.msra.mxu0 %v3416_v54  ;;  %1936 = vmatpush2.bf16.msra.mxu1 %v3418_v55  ;;  %v133_v54 = vld [vmem:[#allocation5 + $0x178] sm:$0xff]  ;;  %v3292_v55 = vcombine.low %v140_v43, %v148_v44  ;;  %v268_v44 = vld [vmem:[#allocation5 + $0x5b0] sm:$0xff] }
  0xea   :  { %1896 = vmatprep.subr.bf16.mxu0 %v3401_v56  ;;  %1937 = vmatprep.subr.bf16.mxu1 %v3403_v57  ;;  %v3294_v56 = vcombine.low %v141_v45, %v149_v46  ;;  %v3277_v57 = vcombine.high %v124_v50, %v132_v51  ;;  %v3279_v58 = vcombine.high %v125_v52, %v133_v54 }
  0xed   :  { %1897 = vmatpush2.bf16.msra.mxu0 %v3400_v63  ;;  %1938 = vmatpush2.bf16.msra.mxu1 %v3402_v0  ;;  %v117_v63 = vld [vmem:[#allocation5 + $0xf8] sm:$0xff]  ;;  %v3276_v0 = vcombine.low %v124_v50, %v132_v51  ;;  %v252_v51 = vld [vmem:[#allocation5 + $0x530] sm:$0xff] }
  0xee   :  { %1898 = vmatprep.subr.bf16.mxu0 %v3385_v1  ;;  %1939 = vmatprep.subr.bf16.mxu1 %v3387_v2  ;;  %v3278_v1 = vcombine.low %v125_v52, %v133_v54  ;;  %v3261_v2 = vcombine.high %v108_v59, %v116_v60  ;;  %v3263_v3 = vcombine.high %v109_v62, %v117_v63  ;;  %v260_v52 = vld [vmem:[#allocation5 + $0x570] sm:$0xff]  ;;  %v253_v54 = vld [vmem:[#allocation5 + $0x538] sm:$0xff] }
  0xf1   :  { %1899 = vmatpush2.bf16.msra.mxu0 %v3384_v7  ;;  %1940 = vmatpush2.bf16.msra.mxu1 %v3386_v8  ;;  %v101_v7 = vld [vmem:[#allocation5 + $0x78] sm:$0xff]  ;;  %v3260_v8 = vcombine.low %v108_v59, %v116_v60  ;;  %v236_v60 = vld [vmem:[#allocation5 + $0x4b0] sm:$0xff] }
  0xf2   :  { %1900 = vmatprep.subr.bf16.mxu0 %v3369_v9  ;;  %1941 = vmatprep.subr.bf16.mxu1 %v3371_v10  ;;  %v3262_v9 = vcombine.low %v109_v62, %v117_v63  ;;  %v3245_v10 = vcombine.high %v92_v4, %v100_v5  ;;  %v3247_v11 = vcombine.high %v93_v6, %v101_v7  ;;  %v244_v62 = vld [vmem:[#allocation5 + $0x4f0] sm:$0xff]  ;;  %v237_v63 = vld [vmem:[#allocation5 + $0x4b8] sm:$0xff] }
  0xf5   :  { %1901 = vmatpush2.bf16.msra.mxu0 %v3368_v16  ;;  %1942 = vmatpush2.bf16.msra.mxu1 %v3370_v17  ;;  %v341_v16 = vld [vmem:[#allocation5 + $0x7f8] sm:$0xff]  ;;  %v3244_v17 = vcombine.low %v92_v4, %v100_v5  ;;  %v220_v5 = vld [vmem:[#allocation5 + $0x430] sm:$0xff] }
  0xf6   :  { %1952 = vmatprep.subr.bf16.mxu0 %v3357_v18  ;;  %1993 = vmatprep.subr.bf16.mxu1 %v3359_v19  ;;  %v3246_v18 = vcombine.low %v93_v6, %v101_v7  ;;  %v3485_v19 = vcombine.high %v332_v12, %v340_v14  ;;  %v3487_v20 = vcombine.high %v333_v15, %v341_v16  ;;  %v228_v6 = vld [vmem:[#allocation5 + $0x470] sm:$0xff]  ;;  %v221_v7 = vld [vmem:[#allocation5 + $0x438] sm:$0xff] }
  0xf8   :  { %1903 = vmatmul.mubr.bf16.vlgmr.msra.gmra.mxu0 %v4021_v13  ;;  %1944 = vmatmul.mubr.bf16.vlgmr.msra.gmra.mxu1 %v4021_v13 }
  0xf9   :  { %1953 = vmatpush1.bf16.msra.mxu0 %v3356_v53  ;;  %1994 = vmatpush1.bf16.msra.mxu1 %v3358_v24  ;;  %v325_v53 = vld [vmem:[#allocation5 + $0x778] sm:$0xff]  ;;  %v3484_v24 = vcombine.low %v332_v12, %v340_v14  ;;  %v3372_v14 = vcombine.low %v220_v5, %v228_v6 }
  0xfa   :  { %1954 = vmatprep.subr.bf16.mxu0 %v3341_v25  ;;  %1995 = vmatprep.subr.bf16.mxu1 %v3343_v26  ;;  %v3486_v25 = vcombine.low %v333_v15, %v341_v16  ;;  %v3469_v26 = vcombine.high %v316_v21, %v324_v22  ;;  %v3471_v27 = vcombine.high %v317_v23, %v325_v53  ;;  %v3629_v16 = vld [vmem:[#allocation8 + $0x74] ss:$8 sps:$4 sm:$0xff]  }
  0xfb   :  { %1984 = vmatprep.mubr.bf16.mxu0 %v4015_v61  ;;  %2025 = vmatprep.mubr.bf16.mxu1 %v4015_v61  ;;  %v3295_v61 = vcombine.high %v141_v45, %v149_v46  ;;  %v276_v45 = vld [vmem:[#allocation5 + $0x5f0] sm:$0xff]  ;;  %v269_v46 = vld [vmem:[#allocation5 + $0x5b8] sm:$0xff] }
  0xfd   :  { %1955 = vmatpush1.bf16.msra.mxu0 %v3340_v31  ;;  %1996 = vmatpush1.bf16.msra.mxu1 %v3342_v32  ;;  %v309_v31 = vld [vmem:[#allocation5 + $0x6f8] sm:$0xff]  ;;  %v3468_v32 = vcombine.low %v316_v21, %v324_v22 }
  0xfe   :  { %1956 = vmatprep.subr.bf16.mxu0 %v3325_v33  ;;  %1997 = vmatprep.subr.bf16.mxu1 %v3327_v34  ;;  %v3470_v33 = vcombine.low %v317_v23, %v325_v53  ;;  %v3453_v34 = vcombine.high %v300_v28, %v308_v29  ;;  %v3455_v35 = vcombine.high %v301_v30, %v309_v31  ;;  %v3638_v21 = vld [vmem:[#allocation8 + $0x164] ss:$8 sps:$4 sm:$0xff]   ;;  %v3633_v53 = vld [vmem:[#allocation8 + $0x60] ss:$8 sps:$4 sm:$0xff]  }
 0x101   :  { %1957 = vmatpush1.bf16.msra.mxu0 %v3324_v39  ;;  %1998 = vmatpush1.bf16.msra.mxu1 %v3326_v40  ;;  %v293_v39 = vld [vmem:[#allocation5 + $0x678] sm:$0xff]  ;;  %v3452_v40 = vcombine.low %v300_v28, %v308_v29 }
 0x102   :  { %1958 = vmatprep.subr.bf16.mxu0 %v3309_v41  ;;  %1999 = vmatprep.subr.bf16.mxu1 %v3311_v42  ;;  %v3454_v41 = vcombine.low %v301_v30, %v309_v31  ;;  %v3437_v42 = vcombine.high %v284_v36, %v292_v37  ;;  %v3439_v43 = vcombine.high %v285_v38, %v293_v39  ;;  %v3641_v31 = vld [vmem:[#allocation8 + $0x54] ss:$8 sps:$4 sm:$0xff]  }
 0x105   :  { %1959 = vmatpush1.bf16.msra.mxu0 %v3308_v47  ;;  %2000 = vmatpush1.bf16.msra.mxu1 %v3310_v48  ;;  %v277_v47 = vld [vmem:[#allocation5 + $0x5f8] sm:$0xff]  ;;  %v3436_v48 = vcombine.low %v284_v36, %v292_v37 }
 0x106   :  { %1960 = vmatprep.subr.bf16.mxu0 %v3293_v49  ;;  %2001 = vmatprep.subr.bf16.mxu1 %v3295_v61  ;;  %v3438_v49 = vcombine.low %v285_v38, %v293_v39  ;;  %v3421_v61 = vcombine.high %v268_v44, %v276_v45  ;;  %v3423_v50 = vcombine.high %v269_v46, %v277_v47  ;;  %v3645_v36 = vld [vmem:[#allocation8 + $0x40] ss:$8 sps:$4 sm:$0xff]   ;;  %v3653_v38 = vld [vmem:[#allocation8 + $0x34] ss:$8 sps:$4 sm:$0xff]  }
 0x107   :  { %v3648_v37 = vld [vmem:[#allocation8 + $0x140] ss:$8 sps:$4 sm:$0xff]   ;;  %v3656_v39 = vld [vmem:[#allocation8 + $0x134] ss:$8 sps:$4 sm:$0xff]  }
 0x109   :  { %1961 = vmatpush1.bf16.msra.mxu0 %v3292_v55  ;;  %2002 = vmatpush1.bf16.msra.mxu1 %v3294_v56  ;;  %v261_v55 = vld [vmem:[#allocation5 + $0x578] sm:$0xff]  ;;  %v3420_v56 = vcombine.low %v268_v44, %v276_v45 }
 0x10a   :  { %1962 = vmatprep.subr.bf16.mxu0 %v3277_v57  ;;  %2003 = vmatprep.subr.bf16.mxu1 %v3279_v58  ;;  %v3422_v57 = vcombine.low %v269_v46, %v277_v47  ;;  %v3405_v58 = vcombine.high %v252_v51, %v260_v52  ;;  %v3407_v59 = vcombine.high %v253_v54, %v261_v55  ;;  %v3657_v44 = vld [vmem:[#allocation8 + $0x20] ss:$8 sps:$4 sm:$0xff]   ;;  %v3665_v46 = vld [vmem:[#allocation8 + $0x14] ss:$8 sps:$4 sm:$0xff]  }
 0x10b   :  { %v3660_v45 = vld [vmem:[#allocation8 + $0x120] ss:$8 sps:$4 sm:$0xff]   ;;  %v3668_v47 = vld [vmem:[#allocation8 + $0x114] ss:$8 sps:$4 sm:$0xff]  }
 0x10d   :  { %1963 = vmatpush1.bf16.msra.mxu0 %v3276_v0  ;;  %2004 = vmatpush1.bf16.msra.mxu1 %v3278_v1  ;;  %v245_v0 = vld [vmem:[#allocation5 + $0x4f8] sm:$0xff]  ;;  %v3404_v1 = vcombine.low %v252_v51, %v260_v52 }
 0x10e   :  { %1964 = vmatprep.subr.bf16.mxu0 %v3261_v2  ;;  %2005 = vmatprep.subr.bf16.mxu1 %v3263_v3  ;;  %v3406_v2 = vcombine.low %v253_v54, %v261_v55  ;;  %v3389_v3 = vcombine.high %v236_v60, %v244_v62  ;;  %v3391_v4 = vcombine.high %v237_v63, %v245_v0  ;;  %v3669_v51 = vld [vmem:[#allocation8] ss:$8 sps:$4 sm:$0xff]   ;;  %v3677_v54 = vld [vmem:[#allocation8 + $0xf4] ss:$8 sps:$4 sm:$0xff]  }
 0x10f   :  { %v3672_v52 = vld [vmem:[#allocation8 + $0x100] ss:$8 sps:$4 sm:$0xff]   ;;  %v3680_v55 = vld [vmem:[#allocation8 + $0x1f4] ss:$8 sps:$4 sm:$0xff]  }
 0x111   :  { %1965 = vmatpush1.bf16.msra.mxu0 %v3260_v8  ;;  %2006 = vmatpush1.bf16.msra.mxu1 %v3262_v9  ;;  %v229_v8 = vld [vmem:[#allocation5 + $0x478] sm:$0xff]  ;;  %v3388_v9 = vcombine.low %v236_v60, %v244_v62 }
 0x112   :  { %1966 = vmatprep.subr.bf16.mxu0 %v3245_v10  ;;  %2007 = vmatprep.subr.bf16.mxu1 %v3247_v11  ;;  %v3390_v10 = vcombine.low %v237_v63, %v245_v0  ;;  %v3373_v11 = vcombine.high %v220_v5, %v228_v6  ;;  %v3375_v12 = vcombine.high %v221_v7, %v229_v8  ;;  %v3681_v60 = vld [vmem:[#allocation8 + $0xe0] ss:$8 sps:$4 sm:$0xff]   ;;  %v3689_v63 = vld [vmem:[#allocation8 + $0xd4] ss:$8 sps:$4 sm:$0xff]  }
 0x113   :  { %v3374_v15 = vcombine.low %v221_v7, %v229_v8  ;;  %v3684_v62 = vld [vmem:[#allocation8 + $0x1e0] ss:$8 sps:$4 sm:$0xff]   ;;  %v3692_v0 = vld [vmem:[#allocation8 + $0x1d4] ss:$8 sps:$4 sm:$0xff]  }
 0x114   :  { %v3693_v5 = vld [vmem:[#allocation8 + $0xc0] ss:$8 sps:$4 sm:$0xff]   ;;  %v3701_v7 = vld [vmem:[#allocation8 + $0xb4] ss:$8 sps:$4 sm:$0xff]  }
 0x115   :  { %1967 = vmatpush1.bf16.msra.mxu0 %v3244_v17  ;;  %2008 = vmatpush1.bf16.msra.mxu1 %v3246_v18  ;;  %v3632_v17 = vld [vmem:[#allocation8 + $0x174] ss:$8 sps:$4 sm:$0xff]   ;;  %v3627_v18 = vld [vmem:[#allocation8 + $0x70] ss:$8 sps:$4 sm:$0xff]   ;;  %v3696_v6 = vld [vmem:[#allocation8 + $0x1c0] ss:$8 sps:$4 sm:$0xff]  }
 0x116   :  { %1968 = vmatprep.subr.bf16.mxu0 %v3485_v19  ;;  %2009 = vmatprep.subr.bf16.mxu1 %v3487_v20  ;;  %v3630_v19 = vld [vmem:[#allocation8 + $0x170] ss:$8 sps:$4 sm:$0xff]   ;;  %v3635_v20 = vld [vmem:[#allocation8 + $0x64] ss:$8 sps:$4 sm:$0xff]   ;;  %v3704_v8 = vld [vmem:[#allocation8 + $0x1b4] ss:$8 sps:$4 sm:$0xff]  }
 0x119   :  { %1969 = vmatpush2.bf16.msra.mxu0 %v3484_v24  ;;  %2010 = vmatpush2.bf16.msra.mxu1 %v3486_v25  ;;  %v3636_v25 = vld [vmem:[#allocation8 + $0x160] ss:$8 sps:$4 sm:$0xff]  }
 0x11a   :  { %1970 = vmatprep.subr.bf16.mxu0 %v3469_v26  ;;  %2011 = vmatprep.subr.bf16.mxu1 %v3471_v27 }
 0x11d   :  { %1971 = vmatpush2.bf16.msra.mxu0 %v3468_v32  ;;  %2012 = vmatpush2.bf16.msra.mxu1 %v3470_v33  ;;  %v3644_v32 = vld [vmem:[#allocation8 + $0x154] ss:$8 sps:$4 sm:$0xff]   ;;  %v3639_v33 = vld [vmem:[#allocation8 + $0x50] ss:$8 sps:$4 sm:$0xff]  }
 0x11e   :  { %1972 = vmatprep.subr.bf16.mxu0 %v3453_v34  ;;  %2013 = vmatprep.subr.bf16.mxu1 %v3455_v35  ;;  %v3647_v34 = vld [vmem:[#allocation8 + $0x44] ss:$8 sps:$4 sm:$0xff]  }
 0x11f   :  { %v3650_v35 = vld [vmem:[#allocation8 + $0x144] ss:$8 sps:$4 sm:$0xff]  }
 0x121   :  { %1973 = vmatpush2.bf16.msra.mxu0 %v3452_v40  ;;  %2014 = vmatpush2.bf16.msra.mxu1 %v3454_v41  ;;  %v3651_v40 = vld [vmem:[#allocation8 + $0x30] ss:$8 sps:$4 sm:$0xff]  }
 0x122   :  { %1974 = vmatprep.subr.bf16.mxu0 %v3437_v42  ;;  %2015 = vmatprep.subr.bf16.mxu1 %v3439_v43  ;;  %v3654_v41 = vld [vmem:[#allocation8 + $0x130] ss:$8 sps:$4 sm:$0xff]   ;;  %v3659_v42 = vld [vmem:[#allocation8 + $0x24] ss:$8 sps:$4 sm:$0xff]  }
 0x123   :  { %v3662_v43 = vld [vmem:[#allocation8 + $0x124] ss:$8 sps:$4 sm:$0xff]  }
 0x125   :  { %1975 = vmatpush2.bf16.msra.mxu0 %v3436_v48  ;;  %2016 = vmatpush2.bf16.msra.mxu1 %v3438_v49  ;;  %v3663_v48 = vld [vmem:[#allocation8 + $0x10] ss:$8 sps:$4 sm:$0xff]  }
 0x126   :  { %1976 = vmatprep.subr.bf16.mxu0 %v3421_v61  ;;  %2017 = vmatprep.subr.bf16.mxu1 %v3423_v50  ;;  %v3666_v49 = vld [vmem:[#allocation8 + $0x110] ss:$8 sps:$4 sm:$0xff]   ;;  %v3671_v61 = vld [vmem:[#allocation8 + $0x4] ss:$8 sps:$4 sm:$0xff]  }
 0x127   :  { %v3674_v50 = vld [vmem:[#allocation8 + $0x104] ss:$8 sps:$4 sm:$0xff]  }
 0x129   :  { %1977 = vmatpush2.bf16.msra.mxu0 %v3420_v56  ;;  %2018 = vmatpush2.bf16.msra.mxu1 %v3422_v57  ;;  %v3675_v56 = vld [vmem:[#allocation8 + $0xf0] ss:$8 sps:$4 sm:$0xff]  }
 0x12a   :  { %1978 = vmatprep.subr.bf16.mxu0 %v3405_v58  ;;  %2019 = vmatprep.subr.bf16.mxu1 %v3407_v59  ;;  %v3678_v57 = vld [vmem:[#allocation8 + $0x1f0] ss:$8 sps:$4 sm:$0xff]   ;;  %v3683_v58 = vld [vmem:[#allocation8 + $0xe4] ss:$8 sps:$4 sm:$0xff]  }
 0x12b   :  { %v3686_v59 = vld [vmem:[#allocation8 + $0x1e4] ss:$8 sps:$4 sm:$0xff]  }
 0x12d   :  { %1979 = vmatpush2.bf16.msra.mxu0 %v3404_v1  ;;  %2020 = vmatpush2.bf16.msra.mxu1 %v3406_v2  ;;  %v3687_v1 = vld [vmem:[#allocation8 + $0xd0] ss:$8 sps:$4 sm:$0xff]  }
 0x12e   :  { %1980 = vmatprep.subr.bf16.mxu0 %v3389_v3  ;;  %2021 = vmatprep.subr.bf16.mxu1 %v3391_v4  ;;  %v3690_v2 = vld [vmem:[#allocation8 + $0x1d0] ss:$8 sps:$4 sm:$0xff]   ;;  %v3695_v3 = vld [vmem:[#allocation8 + $0xc4] ss:$8 sps:$4 sm:$0xff]  }
 0x12f   :  { %v3698_v4 = vld [vmem:[#allocation8 + $0x1c4] ss:$8 sps:$4 sm:$0xff]  }
 0x131   :  { %1981 = vmatpush2.bf16.msra.mxu0 %v3388_v9  ;;  %2022 = vmatpush2.bf16.msra.mxu1 %v3390_v10  ;;  %v3699_v9 = vld [vmem:[#allocation8 + $0xb0] ss:$8 sps:$4 sm:$0xff]  }
 0x132   :  { %1982 = vmatprep.subr.bf16.mxu0 %v3373_v11  ;;  %2023 = vmatprep.subr.bf16.mxu1 %v3375_v12  ;;  %v3702_v10 = vld [vmem:[#allocation8 + $0x1b0] ss:$8 sps:$4 sm:$0xff]   ;;  %v3707_v11 = vld [vmem:[#allocation8 + $0xa4] ss:$8 sps:$4 sm:$0xff]  }
 0x133   :  { %v3710_v12 = vld [vmem:[#allocation8 + $0x1a4] ss:$8 sps:$4 sm:$0xff]  }
 0x135   :  { %1983 = vmatpush2.bf16.msra.mxu0 %v3372_v14  ;;  %2024 = vmatpush2.bf16.msra.mxu1 %v3374_v15  ;;  %v3705_v14 = vld [vmem:[#allocation8 + $0xa0] ss:$8 sps:$4 sm:$0xff]  }
 0x136   :  { %3038 = vmatprep.subr.bf16.mxu0 %v3629_v16  ;;  %3079 = vmatprep.subr.bf16.mxu1 %v3632_v17  ;;  %v3708_v15 = vld [vmem:[#allocation8 + $0x1a0] ss:$8 sps:$4 sm:$0xff]   ;;  %v3711_v16 = vld [vmem:[#allocation8 + $0x90] ss:$8 sps:$4 sm:$0xff]   ;;  %v3713_v17 = vld [vmem:[#allocation8 + $0x94] ss:$8 sps:$4 sm:$0xff]  }
 0x138   :  { %v4035_v22 = vpop.f32.mrf.mxu0  ;;  %1985 = vmatmul.mubr.bf16.vlgmr.msra.gmra.mxu0 %v4021_v13  ;;  %v4038_v23 = vpop.f32.mrf.mxu1  ;;  %2026 = vmatmul.mubr.bf16.vlgmr.msra.gmra.mxu1 %v4021_v13  ;;  %v3642_v13 = vld [vmem:[#allocation8 + $0x150] ss:$8 sps:$4 sm:$0xff]  }
 0x139   :  { %3039 = vmatpush1.bf16.msra.mxu0 %v3627_v18  ;;  %3080 = vmatpush1.bf16.msra.mxu1 %v3630_v19  ;;  %v3714_v18 = vld [vmem:[#allocation8 + $0x190] ss:$8 sps:$4 sm:$0xff]   ;;  %v3716_v19 = vld [vmem:[#allocation8 + $0x194] ss:$8 sps:$4 sm:$0xff]  }
 0x13a   :  { %v4041_v24 = vpop.f32.mrf.mxu0  ;;  %3040 = vmatprep.subr.bf16.mxu0 %v3635_v20  ;;  %v4043_v26 = vpop.f32.mrf.mxu1  ;;  %3081 = vmatprep.subr.bf16.mxu1 %v3638_v21  ;;  %v3719_v20 = vld [vmem:[#allocation8 + $0x84] ss:$8 sps:$4 sm:$0xff]  }
 0x13b   :  { %v3722_v21 = vld [vmem:[#allocation8 + $0x184] ss:$8 sps:$4 sm:$0xff]  }
 0x13c   :  { %v1744_v27 = vpop.f32.mrf.mxu0  ;;  %v1785_v28 = vpop.f32.mrf.mxu1 }
 0x13d   :  { %3041 = vmatpush1.bf16.msra.mxu0 %v3633_v53  ;;  %3082 = vmatpush1.bf16.msra.mxu1 %v3636_v25  ;;  %v3717_v53 = vld [vmem:[#allocation8 + $0x80] ss:$8 sps:$4 sm:$0xff]   ;;  %v3725_v28 = vld [vmem:[#allocation8 + $0x274] ss:$8 sps:$4 sm:$0xff]  }
 0x13e   :  { %v1745_v29 = vpop.f32.mrf.mxu0  ;;  %v1786_v30 = vpop.f32.mrf.mxu1  ;;  %3042 = vmatprep.subr.bf16.mxu0 %v3641_v31  ;;  %3083 = vmatprep.subr.bf16.mxu1 %v3644_v32  ;;  %v3720_v25 = vld [vmem:[#allocation8 + $0x180] ss:$8 sps:$4 sm:$0xff]  }
 0x13f   :  { %v3728_v30 = vld [vmem:[#allocation8 + $0x374] ss:$8 sps:$4 sm:$0xff]  }
 0x141   :  { %3043 = vmatpush1.bf16.msra.mxu0 %v3639_v33  ;;  %3084 = vmatpush1.bf16.msra.mxu1 %v3642_v13 }
 0x142   :  { %3044 = vmatprep.subr.bf16.mxu0 %v3647_v34  ;;  %3085 = vmatprep.subr.bf16.mxu1 %v3650_v35 }
 0x145   :  { %3045 = vmatpush1.bf16.msra.mxu0 %v3645_v36  ;;  %3086 = vmatpush1.bf16.msra.mxu1 %v3648_v37  ;;  %v346_v36 = vlaneseq }
 0x146   :  { %3046 = vmatprep.subr.bf16.mxu0 %v3653_v38  ;;  %3087 = vmatprep.subr.bf16.mxu1 %v3656_v39  ;;  %v4055_v38 = vld [vmem:[#allocation7 + $0x8] sm:$0xff] }
 0x147   :  { %v4053_v37 = vshrl.u32 %v346_v36, 7 }
 0x149   :  { %3047 = vmatpush1.bf16.msra.mxu0 %v3651_v40  ;;  %3088 = vmatpush1.bf16.msra.mxu1 %v3654_v41  ;;  %v4058_v39 = vsub.s32 0, %v4053_v37  ;;  %v356_v40 = vsub.s32 2, %v4053_v37  ;;  %v4062_v41 = vsub.s32 1, %v4053_v37 }
 0x14a   :  { %3048 = vmatprep.subr.bf16.mxu0 %v3659_v42  ;;  %3089 = vmatprep.subr.bf16.mxu1 %v3662_v43  ;;  %v360_v43 = vsub.s32 3, %v4053_v37 }
 0x14b   :  { %v381_v42 = vrot.slane %v4055_v38, %v4058_v39 }
 0x14d   :  { %3049 = vmatpush1.bf16.msra.mxu0 %v3657_v44  ;;  %3090 = vmatpush1.bf16.msra.mxu1 %v3660_v45  ;;  %v389_v44 = vrot.slane %v4055_v38, %v356_v40  ;;  %v385_v45 = vrot.slane %v4055_v38, %v4062_v41 }
 0x14e   :  { %3050 = vmatprep.subr.bf16.mxu0 %v3665_v46  ;;  %3091 = vmatprep.subr.bf16.mxu1 %v3668_v47  ;;  %v393_v47 = vrot.slane %v4055_v38, %v360_v43 }
 0x151   :  { %3051 = vmatpush1.bf16.msra.mxu0 %v3663_v48  ;;  %3092 = vmatpush1.bf16.msra.mxu1 %v3666_v49 }
 0x152   :  { %3052 = vmatprep.subr.bf16.mxu0 %v3671_v61  ;;  %3093 = vmatprep.subr.bf16.mxu1 %v3674_v50 }
 0x155   :  { %3053 = vmatpush1.bf16.msra.mxu0 %v3669_v51  ;;  %3094 = vmatpush1.bf16.msra.mxu1 %v3672_v52 }
 0x156   :  { %3054 = vmatprep.subr.bf16.mxu0 %v3677_v54  ;;  %3095 = vmatprep.subr.bf16.mxu1 %v3680_v55 }
 0x159   :  { %3055 = vmatpush2.bf16.msra.mxu0 %v3675_v56  ;;  %3096 = vmatpush2.bf16.msra.mxu1 %v3678_v57 }
 0x15a   :  { %3056 = vmatprep.subr.bf16.mxu0 %v3683_v58  ;;  %3097 = vmatprep.subr.bf16.mxu1 %v3686_v59 }
 0x15d   :  { %3057 = vmatpush2.bf16.msra.mxu0 %v3681_v60  ;;  %3098 = vmatpush2.bf16.msra.mxu1 %v3684_v62 }
 0x15e   :  { %3058 = vmatprep.subr.bf16.mxu0 %v3689_v63  ;;  %3099 = vmatprep.subr.bf16.mxu1 %v3692_v0 }
 0x161   :  { %3059 = vmatpush2.bf16.msra.mxu0 %v3687_v1  ;;  %3100 = vmatpush2.bf16.msra.mxu1 %v3690_v2 }
 0x162   :  { %3060 = vmatprep.subr.bf16.mxu0 %v3695_v3  ;;  %3101 = vmatprep.subr.bf16.mxu1 %v3698_v4 }
 0x165   :  { %3061 = vmatpush2.bf16.msra.mxu0 %v3693_v5  ;;  %3102 = vmatpush2.bf16.msra.mxu1 %v3696_v6 }
 0x166   :  { %3062 = vmatprep.subr.bf16.mxu0 %v3701_v7  ;;  %3103 = vmatprep.subr.bf16.mxu1 %v3704_v8 }
 0x169   :  { %3063 = vmatpush2.bf16.msra.mxu0 %v3699_v9  ;;  %3104 = vmatpush2.bf16.msra.mxu1 %v3702_v10 }
 0x16a   :  { %3064 = vmatprep.subr.bf16.mxu0 %v3707_v11  ;;  %3105 = vmatprep.subr.bf16.mxu1 %v3710_v12 }
 0x16d   :  { %3065 = vmatpush2.bf16.msra.mxu0 %v3705_v14  ;;  %3106 = vmatpush2.bf16.msra.mxu1 %v3708_v15 }
 0x16e   :  { %3066 = vmatprep.subr.bf16.mxu0 %v3713_v17  ;;  %3107 = vmatprep.subr.bf16.mxu1 %v3716_v19 }
 0x171   :  { %3067 = vmatpush2.bf16.msra.mxu0 %v3711_v16  ;;  %3108 = vmatpush2.bf16.msra.mxu1 %v3714_v18 }
 0x172   :  { %3068 = vmatprep.subr.bf16.mxu0 %v3719_v20  ;;  %3109 = vmatprep.subr.bf16.mxu1 %v3722_v21 }
 0x175   :  { %3069 = vmatpush2.bf16.msra.mxu0 %v3717_v53  ;;  %3110 = vmatpush2.bf16.msra.mxu1 %v3720_v25 }
 0x176   :  { %3120 = vmatprep.subr.bf16.mxu0 %v3725_v28  ;;  %3161 = vmatprep.subr.bf16.mxu1 %v3728_v30 }
 0x178   :  { %v4045_v27 = vpop.f32.mrf.mxu0  ;;  %v4047_v29 = vpop.f32.mrf.mxu1 }
 0x17a   :  { %v4049_v31 = vpop.f32.mrf.mxu0  ;;  %v4051_v32 = vpop.f32.mrf.mxu1 }
 0x17c   :  { %v1826_v33 = vpop.f32.mrf.mxu0  ;;  %v1867_v13 = vpop.f32.mrf.mxu1 }
 0x17e   :  { %v1827_v34 = vpop.f32.mrf.mxu0  ;;  %v1868_v35 = vpop.f32.mrf.mxu1 }
 0x1b8   :  { %v1904_v46 = vpop.f32.mrf.mxu0  ;;  %v1945_v49 = vpop.f32.mrf.mxu1 }
 0x1b9   :  { %v4075_v48 = vadd.f32 %v1904_v46, %v381_v42  ;;  %v4077_v61 = vadd.f32 %v1945_v49, %v389_v44 }
 0x1ba   :  { %v1906_v50 = vpop.f32.mrf.mxu0  ;;  %v1947_v54 = vpop.f32.mrf.mxu1 }
 0x1bb   :  { %v4080_v51 = vmul.f32 0.70710677, %v4075_v48  ;;  %v4082_v52 = vadd.f32 %v1906_v50, %v385_v45  ;;  %v4085_v55 = vmul.f32 0.70710677, %v4077_v61  ;;  %v4087_v56 = vadd.f32 %v1947_v54, %v393_v47 }
 0x1bc   :  { %v1908_v57 = vpop.f32.mrf.mxu0  ;;  %v1949_v60 = vpop.f32.mrf.mxu1 }
 0x1bd   :  { %v2058_v58 = vand.u32 2147483647, %v4080_v51  ;;  %v4091_v59 = vmul.f32 0.70710677, %v4082_v52  ;;  %v2060_v62 = vand.u32 2147483647, %v4085_v55 }
 0x1be   :  { %v4095_v63 = vmul.f32 0.70710677, %v4087_v56  ;;  %v1909_v0 = vpop.f32.mrf.mxu0  ;;  %v1950_v2 = vpop.f32.mrf.mxu1  ;;  %vm2042_vm0 = vcmp.ge.f32.partialorder %v4080_v51, 0.0  ;;  %vm2044_vm1 = vcmp.ge.f32.partialorder %v4085_v55, 0.0 }
 0x1bf   :  { %v2066_v1 = vmul.f32 0.3275911, %v2058_v58  ;;  %v2068_v3 = vmul.f32 0.3275911, %v2060_v62  ;;  %v2059_v4 = vand.u32 2147483647, %v4091_v59 }
 0x1c0   :  { %v2061_v6 = vand.u32 2147483647, %v4095_v63  ;;  %v2162_v12 = vsub.f32 0.0, %v2058_v58  ;;  %v2164_v14 = vsub.f32 0.0, %v2060_v62  ;;  %vm2043_vm2 = vcmp.ge.f32.partialorder %v4091_v59, 0.0 }
 0x1c1   :  { %v2074_v5 = vadd.f32 1.0, %v2066_v1  ;;  %v2076_v7 = vadd.f32 1.0, %v2068_v3  ;;  %v2067_v8 = vmul.f32 0.3275911, %v2059_v4  ;;  %v2163_v16 = vsub.f32 0.0, %v2059_v4 }
 0x1c2   :  { %v2069_v9 = vmul.f32 0.3275911, %v2061_v6  ;;  %v2170_v15 = vmul.f32 %v2162_v12, %v2058_v58  ;;  %v2172_v17 = vmul.f32 %v2164_v14, %v2060_v62  ;;  %v2165_v18 = vsub.f32 0.0, %v2061_v6 }
 0x1c3   :  { %3819 = vrcp.f32 %v2074_v5  ;;  %v2075_v10 = vadd.f32 1.0, %v2067_v8  ;;  %v2171_v25 = vmul.f32 %v2163_v16, %v2059_v4  ;;  %vm2045_vm3 = vcmp.ge.f32.partialorder %v4095_v63, 0.0 }
 0x1c4   :  { %3821 = vrcp.f32 %v2076_v7  ;;  %v2077_v11 = vadd.f32 1.0, %v2069_v9  ;;  %v2178_v53 = vmul.f32 1.442695, %v2170_v15  ;;  %v2182_v30 = vmul.f32 1.442695, %v2172_v17 }
 0x1c5   :  { %3823 = vrcp.f32 %v2075_v10  ;;  %v2173_v33 = vmul.f32 %v2165_v18, %v2061_v6  ;;  %v2180_v44 = vmul.f32 1.442695, %v2171_v25  ;;  %v2220_v63 = vmul.f32 0.5, %v4077_v61 }
 0x1c6   :  { %3825 = vrcp.f32 %v2077_v11 }
 0x1c7   :  { %3827 = vpow2.f32 %v2178_v53  ;;  %v2184_v47 = vmul.f32 1.442695, %v2173_v33 }
 0x1c8   :  { %3829 = vpow2.f32 %v2182_v30 }
 0x1c9   :  { %3831 = vpow2.f32 %v2180_v44 }
 0x1ca   :  { %3833 = vpow2.f32 %v2184_v47  ;;  %v4103_v47 = vld [vmem:[#allocation7] sm:$0xff] }
 0x1cb   :  { %v353_v59 = vrot.slane %v4103_v47, %v4062_v41 }
 0x1d0   :  { %v3820_v19 = vpop.eup %3819 }
 0x1d1   :  { %v3822_v20 = vpop.eup %3821  ;;  %v2090_v21 = vmul.f32 1.0614054, %v3820_v19 }
 0x1d2   :  { %v2092_v28 = vmul.f32 1.0614054, %v3822_v20  ;;  %v3824_v34 = vpop.eup %3823 }
 0x1d3   :  { %v2098_v13 = vadd.f32 -1.4531521, %v2090_v21  ;;  %v2091_v42 = vmul.f32 1.0614054, %v3824_v34  ;;  %v3826_v45 = vpop.eup %3825 }
 0x1d4   :  { %v2100_v35 = vadd.f32 -1.4531521, %v2092_v28  ;;  %v2093_v54 = vmul.f32 1.0614054, %v3826_v45  ;;  %v3828_v17 = vpop.eup %3827 }
 0x1d5   :  { %v2106_v36 = vmul.f32 %v3820_v19, %v2098_v13  ;;  %v2099_v50 = vadd.f32 -1.4531521, %v2091_v42  ;;  %v3830_v21 = vpop.eup %3829  ;;  %v3967_v42 = vmov -1.0  }
 0x1d6   :  { %v2108_v46 = vmul.f32 %v3822_v20, %v2100_v35  ;;  %v2101_v62 = vadd.f32 -1.4531521, %v2093_v54  ;;  %v2052_v44 = vsel %vm2044_vm1, 1.0, %v3967_v42 }
 0x1d7   :  { %v2114_v49 = vadd.f32 1.4214138, %v2106_v36  ;;  %v2107_v60 = vmul.f32 %v3824_v34, %v2099_v50  ;;  %v3832_v36 = vpop.eup %3831 }
 0x1d8   :  { %v2116_v57 = vadd.f32 1.4214138, %v2108_v46  ;;  %v2109_v3 = vmul.f32 %v3826_v45, %v2101_v62 }
 0x1d9   :  { %v2122_v58 = vmul.f32 %v3820_v19, %v2114_v49  ;;  %v2115_v2 = vadd.f32 1.4214138, %v2107_v60  ;;  %v3834_v49 = vpop.eup %3833  ;;  %v2218_v60 = vmul.f32 0.5, %v4075_v48  ;;  %v361_v48 = vrot.slane %v4103_v47, %v360_v43 }
 0x1da   :  { %v2124_v0 = vmul.f32 %v3822_v20, %v2116_v57  ;;  %v2117_v7 = vadd.f32 1.4214138, %v2109_v3 }
 0x1db   :  { %v2130_v1 = vadd.f32 -0.28449672, %v2122_v58  ;;  %v2123_v6 = vmul.f32 %v3824_v34, %v2115_v2  ;;  %v349_v58 = vrot.slane %v4103_v47, %v4058_v39  ;;  %v357_v2 = vrot.slane %v4103_v47, %v356_v40 }
 0x1dc   :  { %v2132_v4 = vadd.f32 -0.28449672, %v2124_v0  ;;  %v2125_v11 = vmul.f32 %v3826_v45, %v2117_v7  ;;  %v2051_v0 = vsel %vm2043_vm2, 1.0, %v3967_v42  ;;  %v2221_v40 = vmul.f32 0.5, %v4087_v56 }
 0x1dd   :  { %v2138_v5 = vmul.f32 %v3820_v19, %v2130_v1  ;;  %v2131_v10 = vadd.f32 -0.28449672, %v2123_v6  ;;  %v1782_v61 = vadd.f32 %v4038_v23, %v357_v2  ;;  %v368_v56 = vsub.s32 5, %v4053_v37  ;;  %v3726_v23 = vld [vmem:[#allocation8 + $0x370] ss:$8 sps:$4 sm:$0xff]  }
 0x1de   :  { %v2140_v8 = vmul.f32 %v3822_v20, %v2132_v4  ;;  %v2133_v16 = vadd.f32 -0.28449672, %v2125_v11  ;;  %v2053_v4 = vsel %vm2045_vm3, 1.0, %v3967_v42 }
 0x1df   :  { %v2146_v9 = vadd.f32 0.2548296, %v2138_v5  ;;  %v2139_v15 = vmul.f32 %v3824_v34, %v2131_v10  ;;  %v2219_v5 = vmul.f32 0.5, %v4082_v52  ;;  %v1743_v10 = vadd.f32 %v4041_v24, %v353_v59 }
 0x1e0   :  { %v2148_v12 = vadd.f32 0.2548296, %v2140_v8  ;;  %v2141_v28 = vmul.f32 %v3826_v45, %v2133_v16  ;;  %v1741_v8 = vadd.f32 %v4035_v22, %v349_v58  ;;  %v364_v52 = vsub.s32 4, %v4053_v37  ;;  %v3723_v22 = vld [vmem:[#allocation8 + $0x270] ss:$8 sps:$4 sm:$0xff]  }
 0x1e1   :  { %v2154_v14 = vmul.f32 %v3820_v19, %v2146_v9  ;;  %v2147_v25 = vadd.f32 0.2548296, %v2139_v15  ;;  %v2050_v19 = vsel %vm2042_vm0, 1.0, %v3967_v42  ;;  %v1784_v15 = vadd.f32 %v4043_v26, %v361_v48 }
 0x1e2   :  { %v2156_v18 = vmul.f32 %v3822_v20, %v2148_v12  ;;  %v2149_v35 = vadd.f32 0.2548296, %v2141_v28  ;;  %v397_v26 = vrot.slane %v4055_v38, %v364_v52 }
 0x1e3   :  { %v2194_v53 = vmul.f32 %v3828_v17, %v2154_v14  ;;  %v2155_v13 = vmul.f32 %v3824_v34, %v2147_v25  ;;  %v3731_v25 = vld [vmem:[#allocation8 + $0x264] ss:$8 sps:$4 sm:$0xff]  }
 0x1e4   :  { %v2196_v30 = vmul.f32 %v3830_v21, %v2156_v18  ;;  %v2157_v55 = vmul.f32 %v3826_v45, %v2149_v35  ;;  %v3734_v35 = vld [vmem:[#allocation8 + $0x364] ss:$8 sps:$4 sm:$0xff]  }
 0x1e5   :  { %v2202_v33 = vsub.f32 1.0, %v2194_v53  ;;  %v2195_v20 = vmul.f32 %v3832_v36, %v2155_v13  ;;  %v372_v53 = vsub.s32 6, %v4053_v37  ;;  %v3729_v36 = vld [vmem:[#allocation8 + $0x260] ss:$8 sps:$4 sm:$0xff]  }
 0x1e6   :  { %v2204_v46 = vsub.f32 1.0, %v2196_v30  ;;  %v2197_v34 = vmul.f32 %v3834_v49, %v2157_v55  ;;  %v376_v30 = vsub.s32 7, %v4053_v37  ;;  %v3732_v49 = vld [vmem:[#allocation8 + $0x360] ss:$8 sps:$4 sm:$0xff]  }
 0x1e7   :  { %v2210_v51 = vmul.f32 %v2202_v33, %v2050_v19  ;;  %v2203_v57 = vsub.f32 1.0, %v2195_v20  ;;  %v405_v13 = vrot.slane %v4055_v38, %v372_v53  ;;  %v401_v19 = vrot.slane %v4055_v38, %v368_v56  ;;  %v3813_v37 = vld [vmem:[#allocation8 + $0x280] ss:$8 sps:$4 sm:$0xff]  }
 0x1e8   :  { %v2212_v50 = vmul.f32 %v2204_v46, %v2052_v44  ;;  %v2205_v45 = vsub.f32 1.0, %v2197_v34  ;;  %v409_v46 = vrot.slane %v4055_v38, %v376_v30 }
 0x1e9   :  { %v2226_v54 = vadd.f32 1.0, %v2210_v51  ;;  %v2211_v1 = vmul.f32 %v2203_v57, %v2051_v0  ;;  %v3737_v51 = vld [vmem:[#allocation8 + $0x254] ss:$8 sps:$4 sm:$0xff]  }
 0x1ea   :  { %v2228_v62 = vadd.f32 1.0, %v2212_v50  ;;  %v2213_v7 = vmul.f32 %v2205_v45, %v2053_v4  ;;  %v3740_v57 = vld [vmem:[#allocation8 + $0x354] ss:$8 sps:$4 sm:$0xff]  }
 0x1eb   :  { %v2234_v3 = vmul.f32 %v2226_v54, %v2218_v60  ;;  %v2227_v6 = vadd.f32 1.0, %v2211_v1  ;;  %v3743_v1 = vld [vmem:[#allocation8 + $0x244] ss:$8 sps:$4 sm:$0xff]  }
 0x1ec   :  { %v2236_v9 = vmul.f32 %v2228_v62, %v2220_v63  ;;  %v2229_v12 = vadd.f32 1.0, %v2213_v7  ;;  %v3735_v62 = vld [vmem:[#allocation8 + $0x250] ss:$8 sps:$4 sm:$0xff]  }
 0x1ed   :  { %v2235_v11 = vmul.f32 %v2227_v6, %v2219_v5  ;;  %v2242_v14 = vmul.f32 %v2234_v3, %v1741_v8  ;;  %v3738_v63 = vld [vmem:[#allocation8 + $0x350] ss:$8 sps:$4 sm:$0xff]   ;;  %v3746_v6 = vld [vmem:[#allocation8 + $0x344] ss:$8 sps:$4 sm:$0xff]  }
 0x1ee   :  { %v2237_v16 = vmul.f32 %v2229_v12, %v2221_v40  ;;  %v2244_v17 = vmul.f32 %v2236_v9, %v1782_v61  ;;  %v3741_v9 = vld [vmem:[#allocation8 + $0x240] ss:$8 sps:$4 sm:$0xff]   ;;  %v3749_v40 = vld [vmem:[#allocation8 + $0x234] ss:$8 sps:$4 sm:$0xff]  }
 0x1ef   :  { %v2243_v43 = vmul.f32 %v2235_v11, %v1743_v10  ;;  %v2250_v24 = vpack.c.bf16 %v2242_v14, %v2242_v14  ;;  %v3744_v14 = vld [vmem:[#allocation8 + $0x340] ss:$8 sps:$4 sm:$0xff]  }
 0x1f0   :  { %v2245_v21 = vmul.f32 %v2237_v16, %v1784_v15  ;;  %v2252_v33 = vpack.c.bf16 %v2244_v17, %v2244_v17 }
 0x1f1   :  { %v2251_v18 = vpack.c.bf16 %v2243_v43, %v2243_v43  ;;  %v3752_v43 = vld [vmem:[#allocation8 + $0x334] ss:$8 sps:$4 sm:$0xff]  }
 0x1f2   :  { %v2253_v28 = vpack.c.bf16 %v2245_v21, %v2245_v21 }
 0x1f3   :  { %3070 = vmatprep.mubr.bf16.mxu0 %v2251_v18  ;;  %v3747_v18 = vld [vmem:[#allocation8 + $0x230] ss:$8 sps:$4 sm:$0xff]  }
 0x1f4   :  { %3071 = vmatmul.mubr.bf16.vlgmr.msra.gmra.mxu0 %v2250_v24  ;;  %3111 = vmatprep.mubr.bf16.mxu1 %v2253_v28  ;;  %v3758_v28 = vld [vmem:[#allocation8 + $0x324] ss:$8 sps:$4 sm:$0xff]  }
 0x1f5   :  { %3121 = vmatpush1.bf16.msra.mxu0 %v3723_v22  ;;  %3112 = vmatmul.mubr.bf16.vlgmr.msra.gmra.mxu1 %v2252_v33  ;;  %v3755_v22 = vld [vmem:[#allocation8 + $0x224] ss:$8 sps:$4 sm:$0xff]  }
 0x1f6   :  { %3122 = vmatprep.subr.bf16.mxu0 %v3731_v25  ;;  %3162 = vmatpush1.bf16.msra.mxu1 %v3726_v23  ;;  %v3750_v25 = vld [vmem:[#allocation8 + $0x330] ss:$8 sps:$4 sm:$0xff]   ;;  %v3753_v23 = vld [vmem:[#allocation8 + $0x220] ss:$8 sps:$4 sm:$0xff]  }
 0x1f7   :  { %3163 = vmatprep.subr.bf16.mxu1 %v3734_v35 }
 0x1f8   :  { %v1986_v44 = vpop.f32.mrf.mxu0  ;;  %v2027_v55 = vpop.f32.mrf.mxu1 }
 0x1f9   :  { %v4143_v20 = vadd.f32 %v1986_v44, %v397_v26  ;;  %v4145_v50 = vadd.f32 %v2027_v55, %v405_v13  ;;  %3123 = vmatpush1.bf16.msra.mxu0 %v3729_v36  ;;  %v3761_v26 = vld [vmem:[#allocation8 + $0x214] ss:$8 sps:$4 sm:$0xff]   ;;  %v3756_v13 = vld [vmem:[#allocation8 + $0x320] ss:$8 sps:$4 sm:$0xff]   ;;  %v3767_v44 = vld [vmem:[#allocation8 + $0x204] ss:$8 sps:$4 sm:$0xff]  }
 0x1fa   :  { %v1988_v54 = vpop.f32.mrf.mxu0  ;;  %v2029_v60 = vpop.f32.mrf.mxu1  ;;  %3124 = vmatprep.subr.bf16.mxu0 %v3737_v51  ;;  %3164 = vmatpush1.bf16.msra.mxu1 %v3732_v49  ;;  %v3764_v36 = vld [vmem:[#allocation8 + $0x314] ss:$8 sps:$4 sm:$0xff]   ;;  %v3762_v55 = vld [vmem:[#allocation8 + $0x310] ss:$8 sps:$4 sm:$0xff]  }
 0x1fb   :  { %v4148_v34 = vmul.f32 0.70710677, %v4143_v20  ;;  %v4150_v58 = vadd.f32 %v1988_v54, %v401_v19  ;;  %v4153_v38 = vmul.f32 0.70710677, %v4145_v50  ;;  %v4155_v0 = vadd.f32 %v2029_v60, %v409_v46  ;;  %3165 = vmatprep.subr.bf16.mxu1 %v3740_v57  ;;  %v3759_v19 = vld [vmem:[#allocation8 + $0x210] ss:$8 sps:$4 sm:$0xff]  }
 0x1fc   :  { %v1990_v59 = vpop.f32.mrf.mxu0  ;;  %v2031_v3 = vpop.f32.mrf.mxu1  ;;  %v3770_v57 = vld [vmem:[#allocation8 + $0x304] ss:$8 sps:$4 sm:$0xff]   ;;  %v3765_v60 = vld [vmem:[#allocation8 + $0x200] ss:$8 sps:$4 sm:$0xff]  }
 0x1fd   :  { %v2062_v45 = vand.u32 2147483647, %v4148_v34  ;;  %v4159_v2 = vmul.f32 0.70710677, %v4150_v58  ;;  %v2064_v4 = vand.u32 2147483647, %v4153_v38  ;;  %3125 = vmatpush1.bf16.msra.mxu0 %v3735_v62 }
 0x1fe   :  { %v4163_v48 = vmul.f32 0.70710677, %v4155_v0  ;;  %v1991_v5 = vpop.f32.mrf.mxu0  ;;  %v2032_v8 = vpop.f32.mrf.mxu1  ;;  %3126 = vmatprep.subr.bf16.mxu0 %v3743_v1  ;;  %3166 = vmatpush1.bf16.msra.mxu1 %v3738_v63  ;;  %v3773_v59 = vld [vmem:[#allocation8 + $0x2f4] ss:$8 sps:$4 sm:$0xff]   ;;  %vm2046_vm4 = vcmp.ge.f32.partialorder %v4148_v34, 0.0  ;;  %vm2048_vm5 = vcmp.ge.f32.partialorder %v4153_v38, 0.0 }
 0x1ff   :  { %v2070_v7 = vmul.f32 0.3275911, %v2062_v45  ;;  %v2072_v10 = vmul.f32 0.3275911, %v2064_v4  ;;  %v2063_v11 = vand.u32 2147483647, %v4159_v2  ;;  %3167 = vmatprep.subr.bf16.mxu1 %v3746_v6 }
 0x200   :  { %v2065_v61 = vand.u32 2147483647, %v4163_v48  ;;  %v2166_v33 = vsub.f32 0.0, %v2062_v45  ;;  %v2168_v35 = vsub.f32 0.0, %v2064_v4  ;;  %v3776_v8 = vld [vmem:[#allocation8 + $0x3f4] ss:$8 sps:$4 sm:$0xff]  }
 0x201   :  { %v2078_v12 = vadd.f32 1.0, %v2070_v7  ;;  %v2080_v15 = vadd.f32 1.0, %v2072_v10  ;;  %v2071_v16 = vmul.f32 0.3275911, %v2063_v11  ;;  %3127 = vmatpush1.bf16.msra.mxu0 %v3741_v9  ;;  %v2167_v51 = vsub.f32 0.0, %v2063_v11 }
 0x202   :  { %v2073_v17 = vmul.f32 0.3275911, %v2065_v61  ;;  %3128 = vmatprep.subr.bf16.mxu0 %v3749_v40  ;;  %3168 = vmatpush1.bf16.msra.mxu1 %v3744_v14  ;;  %v2174_v46 = vmul.f32 %v2166_v33, %v2062_v45  ;;  %v2176_v49 = vmul.f32 %v2168_v35, %v2064_v4  ;;  %v2169_v54 = vsub.f32 0.0, %v2065_v61  ;;  %v3768_v45 = vld [vmem:[#allocation8 + $0x300] ss:$8 sps:$4 sm:$0xff]  }
 0x203   :  { %3835 = vrcp.f32 %v2078_v12  ;;  %v2079_v21 = vadd.f32 1.0, %v2071_v16  ;;  %3169 = vmatprep.subr.bf16.mxu1 %v3752_v43  ;;  %v2175_v5 = vmul.f32 %v2167_v51, %v2063_v11  ;;  %v3771_v10 = vld [vmem:[#allocation8 + $0x2f0] ss:$8 sps:$4 sm:$0xff]   ;;  %v3779_v14 = vld [vmem:[#allocation8 + $0x2e4] ss:$8 sps:$4 sm:$0xff]   ;;  %v2056_v38 = vsel %vm2048_vm5, 1.0, %v3967_v42 }
 0x204   :  { %3837 = vrcp.f32 %v2080_v15  ;;  %v2081_v24 = vadd.f32 1.0, %v2073_v17  ;;  %v2186_v63 = vmul.f32 1.442695, %v2174_v46  ;;  %v2190_v4 = vmul.f32 1.442695, %v2176_v49 }
 0x205   :  { %3839 = vrcp.f32 %v2079_v21  ;;  %3129 = vmatpush1.bf16.msra.mxu0 %v3747_v18  ;;  %v2177_v7 = vmul.f32 %v2169_v54, %v2065_v61  ;;  %v2188_v16 = vmul.f32 1.442695, %v2175_v5  ;;  %v3774_v43 = vld [vmem:[#allocation8 + $0x3f0] ss:$8 sps:$4 sm:$0xff]   ;;  %v3777_v21 = vld [vmem:[#allocation8 + $0x2e0] ss:$8 sps:$4 sm:$0xff]  }
 0x206   :  { %3130 = vmatprep.subr.bf16.mxu0 %v3755_v22  ;;  %3841 = vrcp.f32 %v2081_v24  ;;  %3170 = vmatpush1.bf16.msra.mxu1 %v3750_v25  ;;  %v3782_v22 = vld [vmem:[#allocation8 + $0x3e4] ss:$8 sps:$4 sm:$0xff]   ;;  %v3783_v49 = vld [vmem:[#allocation8 + $0x2d0] ss:$8 sps:$4 sm:$0xff]   ;;  %vm2047_vm6 = vcmp.ge.f32.partialorder %v4159_v2, 0.0  ;;  %vm2049_vm7 = vcmp.ge.f32.partialorder %v4163_v48, 0.0 }
 0x207   :  { %3171 = vmatprep.subr.bf16.mxu1 %v3758_v28  ;;  %3843 = vpow2.f32 %v2186_v63  ;;  %v2192_v18 = vmul.f32 1.442695, %v2177_v7  ;;  %v3786_v63 = vld [vmem:[#allocation8 + $0x3d0] ss:$8 sps:$4 sm:$0xff]   ;;  %v2057_v2 = vsel %vm2049_vm7, 1.0, %v3967_v42 }
 0x208   :  { %3845 = vpow2.f32 %v2190_v4 }
 0x209   :  { %3131 = vmatpush1.bf16.msra.mxu0 %v3753_v23  ;;  %3847 = vpow2.f32 %v2188_v16 }
 0x20a   :  { %3132 = vmatprep.subr.bf16.mxu0 %v3761_v26  ;;  %3172 = vmatpush1.bf16.msra.mxu1 %v3756_v13  ;;  %v3785_v26 = vld [vmem:[#allocation8 + $0x2d4] ss:$8 sps:$4 sm:$0xff]   ;;  %3849 = vpow2.f32 %v2192_v18 }
 0x20b   :  { %3173 = vmatprep.subr.bf16.mxu1 %v3764_v36  ;;  %v3780_v36 = vld [vmem:[#allocation8 + $0x3e0] ss:$8 sps:$4 sm:$0xff]  }
 0x20d   :  { %3133 = vmatpush1.bf16.msra.mxu0 %v3759_v19 }
 0x20e   :  { %3134 = vmatprep.subr.bf16.mxu0 %v3767_v44  ;;  %3174 = vmatpush1.bf16.msra.mxu1 %v3762_v55  ;;  %v3788_v44 = vld [vmem:[#allocation8 + $0x3d4] ss:$8 sps:$4 sm:$0xff]  }
 0x20f   :  { %3175 = vmatprep.subr.bf16.mxu1 %v3770_v57  ;;  %v3791_v57 = vld [vmem:[#allocation8 + $0x2c4] ss:$8 sps:$4 sm:$0xff]  }
 0x210   :  { %v4167_v62 = vpop.eup %3835 }
 0x211   :  { %v4169_v1 = vpop.eup %3837  ;;  %v2094_v3 = vmul.f32 1.0614054, %v4167_v62  ;;  %3135 = vmatpush1.bf16.msra.mxu0 %v3765_v60 }
 0x212   :  { %v2096_v6 = vmul.f32 1.0614054, %v4169_v1  ;;  %v4173_v40 = vpop.eup %3839  ;;  %3136 = vmatprep.subr.bf16.mxu0 %v3773_v59  ;;  %3176 = vmatpush1.bf16.msra.mxu1 %v3768_v45  ;;  %v3794_v45 = vld [vmem:[#allocation8 + $0x3c4] ss:$8 sps:$4 sm:$0xff]  }
 0x213   :  { %v2102_v9 = vadd.f32 -1.4531521, %v2094_v3  ;;  %v2095_v11 = vmul.f32 1.0614054, %v4173_v40  ;;  %v4177_v17 = vpop.eup %3841  ;;  %3177 = vmatprep.subr.bf16.mxu1 %v3776_v8  ;;  %v3789_v8 = vld [vmem:[#allocation8 + $0x2c0] ss:$8 sps:$4 sm:$0xff]  }
 0x214   :  { %v2104_v12 = vadd.f32 -1.4531521, %v2096_v6  ;;  %v2097_v28 = vmul.f32 1.0614054, %v4177_v17  ;;  %v3844_v16 = vpop.eup %3843 }
 0x215   :  { %v2110_v15 = vmul.f32 %v4167_v62, %v2102_v9  ;;  %v2103_v25 = vadd.f32 -1.4531521, %v2095_v11  ;;  %3137 = vmatpush2.bf16.msra.mxu0 %v3771_v10  ;;  %v3797_v10 = vld [vmem:[#allocation8 + $0x2b4] ss:$8 sps:$4 sm:$0xff]   ;;  %v3792_v11 = vld [vmem:[#allocation8 + $0x3c0] ss:$8 sps:$4 sm:$0xff]   ;;  %v3846_v18 = vpop.eup %3845 }
 0x216   :  { %v2112_v61 = vmul.f32 %v4169_v1, %v2104_v12  ;;  %3138 = vmatprep.subr.bf16.mxu0 %v3779_v14  ;;  %v2105_v35 = vadd.f32 -1.4531521, %v2097_v28  ;;  %3178 = vmatpush2.bf16.msra.mxu1 %v3774_v43  ;;  %v3803_v28 = vld [vmem:[#allocation8 + $0x2a4] ss:$8 sps:$4 sm:$0xff]  }
 0x217   :  { %v2118_v24 = vadd.f32 1.4214138, %v2110_v15  ;;  %v2111_v13 = vmul.f32 %v4173_v40, %v2103_v25  ;;  %3179 = vmatprep.subr.bf16.mxu1 %v3782_v22 }
 0x218   :  { %v2120_v23 = vadd.f32 1.4214138, %v2112_v61  ;;  %v2113_v55 = vmul.f32 %v4177_v17, %v2105_v35  ;;  %v3800_v61 = vld [vmem:[#allocation8 + $0x3b4] ss:$8 sps:$4 sm:$0xff]   ;;  %v2054_v35 = vsel %vm2046_vm4, 1.0, %v3967_v42 }
 0x219   :  { %v2126_v33 = vmul.f32 %v4167_v62, %v2118_v24  ;;  %v2119_v51 = vadd.f32 1.4214138, %v2111_v13  ;;  %3139 = vmatpush2.bf16.msra.mxu0 %v3777_v21  ;;  %v3848_v13 = vpop.eup %3847 }
 0x21a   :  { %v2128_v19 = vmul.f32 %v4169_v1, %v2120_v23  ;;  %3140 = vmatprep.subr.bf16.mxu0 %v3785_v26  ;;  %v2121_v3 = vadd.f32 1.4214138, %v2113_v55  ;;  %3180 = vmatpush2.bf16.msra.mxu1 %v3780_v36  ;;  %v3850_v55 = vpop.eup %3849 }
 0x21b   :  { %v2134_v46 = vadd.f32 -0.28449672, %v2126_v33  ;;  %v2127_v59 = vmul.f32 %v4173_v40, %v2119_v51  ;;  %3181 = vmatprep.subr.bf16.mxu1 %v3788_v44 }
 0x21c   :  { %v2136_v54 = vadd.f32 -0.28449672, %v2128_v19  ;;  %v2129_v7 = vmul.f32 %v4177_v17, %v2121_v3  ;;  %v3806_v19 = vld [vmem:[#allocation8 + $0x3a4] ss:$8 sps:$4 sm:$0xff]   ;;  %v365_v3 = vrot.slane %v4103_v47, %v364_v52  ;;  %v373_v52 = vrot.slane %v4103_v47, %v372_v53 }
 0x21d   :  { %v2142_v60 = vmul.f32 %v4167_v62, %v2134_v46  ;;  %v2135_v4 = vadd.f32 -0.28449672, %v2127_v59  ;;  %3141 = vmatpush2.bf16.msra.mxu0 %v3783_v49  ;;  %v3804_v59 = vld [vmem:[#allocation8 + $0x3a0] ss:$8 sps:$4 sm:$0xff]  }
 0x21e   :  { %v2144_v5 = vmul.f32 %v4169_v1, %v2136_v54  ;;  %3142 = vmatprep.subr.bf16.mxu0 %v3791_v57  ;;  %v2137_v15 = vadd.f32 -0.28449672, %v2129_v7  ;;  %3182 = vmatpush2.bf16.msra.mxu1 %v3786_v63  ;;  %v3809_v54 = vld [vmem:[#allocation8 + $0x294] ss:$8 sps:$4 sm:$0xff]   ;;  %v2222_v63 = vmul.f32 0.5, %v4143_v20  ;;  %v1823_v53 = vadd.f32 %v4045_v27, %v365_v3 }
 0x21f   :  { %v2150_v6 = vadd.f32 0.2548296, %v2142_v60  ;;  %v2143_v14 = vmul.f32 %v4173_v40, %v2135_v4  ;;  %3183 = vmatprep.subr.bf16.mxu1 %v3794_v45  ;;  %v3812_v45 = vld [vmem:[#allocation8 + $0x394] ss:$8 sps:$4 sm:$0xff]   ;;  %v3816_v27 = vld [vmem:[#allocation8 + $0x380] ss:$8 sps:$4 sm:$0xff]  }
 0x220   :  { %v2152_v9 = vadd.f32 0.2548296, %v2144_v5  ;;  %v2145_v24 = vmul.f32 %v4177_v17, %v2137_v15  ;;  %v2055_v5 = vsel %vm2047_vm6, 1.0, %v3967_v42 }
 0x221   :  { %v2158_v12 = vmul.f32 %v4167_v62, %v2150_v6  ;;  %v2151_v22 = vadd.f32 0.2548296, %v2143_v14  ;;  %3143 = vmatpush2.bf16.msra.mxu0 %v3789_v8  ;;  %v3795_v62 = vld [vmem:[#allocation8 + $0x2b0] ss:$8 sps:$4 sm:$0xff]   ;;  %v369_v6 = vrot.slane %v4103_v47, %v368_v56  ;;  %v377_v56 = vrot.slane %v4103_v47, %v376_v30 }
 0x222   :  { %v2160_v43 = vmul.f32 %v4169_v1, %v2152_v9  ;;  %3144 = vmatprep.subr.bf16.mxu0 %v3797_v10  ;;  %v2153_v33 = vadd.f32 0.2548296, %v2145_v24  ;;  %3184 = vmatpush2.bf16.msra.mxu1 %v3792_v11  ;;  %v3798_v1 = vld [vmem:[#allocation8 + $0x3b0] ss:$8 sps:$4 sm:$0xff]   ;;  %v2224_v9 = vmul.f32 0.5, %v4145_v50  ;;  %v1864_v47 = vadd.f32 %v4047_v29, %v373_v52 }
 0x223   :  { %v2198_v21 = vmul.f32 %v3844_v16, %v2158_v12  ;;  %v2159_v26 = vmul.f32 %v4173_v40, %v2151_v22  ;;  %3185 = vmatprep.subr.bf16.mxu1 %v3800_v61  ;;  %v3801_v40 = vld [vmem:[#allocation8 + $0x2a0] ss:$8 sps:$4 sm:$0xff]   ;;  %v3807_v8 = vld [vmem:[#allocation8 + $0x290] ss:$8 sps:$4 sm:$0xff]   ;;  %v3815_v10 = vld [vmem:[#allocation8 + $0x284] ss:$8 sps:$4 sm:$0xff]   ;;  %v1825_v48 = vadd.f32 %v4049_v31, %v369_v6 }
 0x224   :  { %v2200_v25 = vmul.f32 %v3846_v18, %v2160_v43  ;;  %v2161_v51 = vmul.f32 %v4177_v17, %v2153_v33  ;;  %v2223_v12 = vmul.f32 0.5, %v4150_v58  ;;  %v3810_v11 = vld [vmem:[#allocation8 + $0x390] ss:$8 sps:$4 sm:$0xff]   ;;  %v3818_v50 = vld [vmem:[#allocation8 + $0x384] ss:$8 sps:$4 sm:$0xff]   ;;  %v2225_v43 = vmul.f32 0.5, %v4155_v0 }
 0x225   :  { %v2206_v23 = vsub.f32 1.0, %v2198_v21  ;;  %v2199_v46 = vmul.f32 %v3848_v13, %v2159_v26  ;;  %3145 = vmatpush2.bf16.msra.mxu0 %v3795_v62  ;;  %v1866_v58 = vadd.f32 %v4051_v32, %v377_v56 }
 0x226   :  { %v2208_v36 = vsub.f32 1.0, %v2200_v25  ;;  %3146 = vmatprep.subr.bf16.mxu0 %v3803_v28  ;;  %v2201_v60 = vmul.f32 %v3850_v55, %v2161_v51  ;;  %3186 = vmatpush2.bf16.msra.mxu1 %v3798_v1 }
 0x227   :  { %v2214_v44 = vmul.f32 %v2206_v23, %v2054_v35  ;;  %v2207_v34 = vsub.f32 1.0, %v2199_v46  ;;  %3187 = vmatprep.subr.bf16.mxu1 %v3806_v19  ;;  %v2386_v35 = vld [vmem:[%s4241_s4] sm:$0x3]  ;;  %s3931_s4 = scalar_lea.vmem %s3221_s16, 64 }
 0x228   :  { %v2216_v49 = vmul.f32 %v2208_v36, %v2056_v38  ;;  %v2209_v7 = vsub.f32 1.0, %v2201_v60  ;;  %v2391_v38 = vrot.slane %v2386_v35, %v4058_v39  ;;  %v2395_v36 = vrot.slane %v2386_v35, %v4062_v41  ;;  %p3932_p6 = scmp.ne.s32.totalorder %s3221_s16, %s3931_s4  ;;  %p3937_p8 = scmp.lt.s32.totalorder %s3931_s4, %s3931_s4 }
 0x229   :  { %v2230_v57 = vadd.f32 1.0, %v2214_v44  ;;  %v2215_v4 = vmul.f32 %v2207_v34, %v2055_v5  ;;  %3147 = vmatpush2.bf16.msra.mxu0 %v3801_v40 }
 0x22a   :  { %v2232_v17 = vadd.f32 1.0, %v2216_v49  ;;  %3148 = vmatprep.subr.bf16.mxu0 %v3809_v54  ;;  %v2217_v15 = vmul.f32 %v2209_v7, %v2057_v2  ;;  %3188 = vmatpush2.bf16.msra.mxu1 %v3804_v59  ;;  %p3938_p9 = por %p3937_p8, %p3936_p7 }
 0x22b   :  { %v2238_v20 = vmul.f32 %v2230_v57, %v2222_v63  ;;  %v2231_v14 = vadd.f32 1.0, %v2215_v4  ;;  %3189 = vmatprep.subr.bf16.mxu1 %v3812_v45 }
 0x22c   :  { %v2240_v16 = vmul.f32 %v2232_v17, %v2224_v9  ;;  %v2233_v61 = vadd.f32 1.0, %v2217_v15  ;;  %p3939_p10 = pnand %p3938_p9, %p3932_p6 }
 0x22d   :  { %v2239_v42 = vmul.f32 %v2231_v14, %v2223_v12  ;;  %3149 = vmatpush2.bf16.msra.mxu0 %v3807_v8  ;;  %v2246_v30 = vmul.f32 %v2238_v20, %v1823_v53 }
 0x22e   :  { %3150 = vmatprep.subr.bf16.mxu0 %v3815_v10  ;;  %v2241_v18 = vmul.f32 %v2233_v61, %v2225_v43  ;;  %3190 = vmatpush2.bf16.msra.mxu1 %v3810_v11  ;;  %v2248_v22 = vmul.f32 %v2240_v16, %v1864_v47 }
 0x22f   :  { %v2247_v21 = vmul.f32 %v2239_v42, %v1825_v48  ;;  %3191 = vmatprep.subr.bf16.mxu1 %v3818_v50  ;;  %v2254_v62 = vpack.c.bf16 %v2246_v30, %v2246_v30 }
 0x230   :  { %v2249_v24 = vmul.f32 %v2241_v18, %v1866_v58  ;;  %v2256_v25 = vpack.c.bf16 %v2248_v22, %v2248_v22 }
 0x231   :  { %3151 = vmatpush2.bf16.msra.mxu0 %v3813_v37  ;;  %v2255_v31 = vpack.c.bf16 %v2247_v21, %v2247_v21 }
 0x232   :  { %3192 = vmatpush2.bf16.msra.mxu1 %v3816_v27  ;;  %v2257_v0 = vpack.c.bf16 %v2249_v24, %v2249_v24 }
 0x233   :  { %3152 = vmatprep.mubr.bf16.mxu0 %v2255_v31 }
 0x234   :  { %3153 = vmatmul.mubr.bf16.vlgmr.msra.gmra.mxu0 %v2254_v62  ;;  %3193 = vmatprep.mubr.bf16.mxu1 %v2257_v0 }
 0x235   :  { %3194 = vmatmul.mubr.bf16.vlgmr.msra.gmra.mxu1 %v2256_v25 }
 0x2b4   :  { %v3072_v29 = vpop.f32.mrf.mxu0 }
 0x2b5   :  { %v3113_v28 = vpop.f32.mrf.mxu1  ;;  %v3073_v19 = vadd.f32 %v3072_v29, %v2391_v38 }
 0x2b6   :  { %v3074_v32 = vpop.f32.mrf.mxu0 }
 0x2b7   :  { %v3115_v23 = vpop.f32.mrf.mxu1  ;;  %v3075_v44 = vadd.f32 %v3074_v32, %v2395_v36  ;;  %v3114_v46 = vadd.f32 %v3113_v28, %v3073_v19 }
 0x2b8   :  { %v3076_v26 = vpop.f32.mrf.mxu0 }
 0x2b9   :  { %v3117_v33 = vpop.f32.mrf.mxu1  ;;  %v3116_v40 = vadd.f32 %v3115_v23, %v3075_v44 }
 0x2ba   :  { %v3077_v1 = vpop.f32.mrf.mxu0 }
 0x2bb   :  { %v3118_v13 = vpop.f32.mrf.mxu1 }
 0x2f4   :  { %v3154_v51 = vpop.f32.mrf.mxu0 }
 0x2f5   :  { %v3155_v55 = vadd.f32 %v3154_v51, %v3114_v46  ;;  %v3195_v49 = vpop.f32.mrf.mxu1 }
 0x2f6   :  { %v3156_v54 = vpop.f32.mrf.mxu0 }
 0x2f7   :  { %v3157_v57 = vadd.f32 %v3156_v54, %v3116_v40  ;;  %v3197_v34 = vpop.f32.mrf.mxu1  ;;  %v3196_v59 = vadd.f32 %v3195_v49, %v3155_v55 }
 0x2f8   :  { %v3158_v60 = vpop.f32.mrf.mxu0 }
 0x2f9   :  { %v3198_v3 = vadd.f32 %v3197_v34, %v3157_v57  ;;  %v3199_v63 = vpop.f32.mrf.mxu1 }
 0x2fa   :  { %v3159_v17 = vpop.f32.mrf.mxu0 }
 0x2fb   :  { %v3204_v39 = vcombine.low %v3196_v59, %v3198_v3  ;;  %v3200_v41 = vpop.f32.mrf.mxu1 }
 0x2fd   :  { %3616 = vst.sshfl [vmem:[#allocation10] sm:$0x33 pattern:$0x76325410] %v3204_v39 }
 0x2fe   :  { %3942 = shalt.err (!%p3939_p10)
}
 0x2ff   :  { %3223 = dma.vmem_to_hbm [thread:$0]  %s3221_s16, 64, %s4242_s5, [#allocation4]  }
 0x300   :  { %3957 = dma.done.wait [#allocation4], 64  }
 0x301   :  { %3958 = vsyncadd [#allocation4], 4294967232 }
 0x302   :  { %3227 = vsyncpa [#allocation3], 1 }
 0x303   :  { %3228 = vsyncpa [#allocation6], 1 }
 0x304   :  { %3229 = vsyncpa [#allocation9], 1 }
 0x305   :  { %3230 = vsyncpa [#allocation4], 1 }

</bundles_post_ra>
